<compile_context>
chip_gen: v5e
topology: v5e:2x2
jax: 0.10.0
libtpu: 0.0.40
codegen_flags: <defaults>
</compile_context>

<pallas_src>
import jax
import jax.numpy as jnp
from jax.experimental import pallas as pl
from jax.experimental.pallas import tpu as pltpu


IN_FEATURES = 28 * 28   # 784
OUT_FEATURES = 10
TB_MAX = 1024           # batch-tile cap; f32 x-tile = 1024*784*4 ~= 3.1 MiB


def linear_kernel(x_ref, w_ref, b_ref, o_ref):
    # x: (tb, 784), w: (784, 10), b: (1, 10), o: (tb, 10)
    acc = jnp.dot(
        x_ref[...],
        w_ref[...],
        preferred_element_type=jnp.float32,
        precision=jax.lax.Precision.HIGHEST,
    )
    o_ref[...] = (acc + b_ref[...]).astype(o_ref.dtype)


def _round_up(x, m):
    return (x + m - 1) // m * m


def _choose_batch_tile(batch):
    # Tiny batches: a single full-extent block (legal: block dim == array dim),
    # no padding at all, grid of 1.
    if batch <= 32:
        return batch
    # Otherwise aim for >= 4 grid steps (even split across v7x's 2 TCs, real
    # double-buffering everywhere), tile a multiple of 8 sublanes, <= TB_MAX.
    return max(8, min(TB_MAX, _round_up(pl.cdiv(batch, 4), 8)))


def simple_net_forward(x, w, b):
    """x: (B, 1, 28, 28) or anything reshapeable to (-1, 784).
    w: (784, 10)  (transposed torch Linear weight)
    b: (10,)
    returns: (B, 10) float32
    """
    x2d = x.reshape(-1, IN_FEATURES).astype(jnp.float32)
    batch = x2d.shape[0]
    if batch == 0:
        return jnp.zeros((0, OUT_FEATURES), jnp.float32)

    w2d = w.astype(jnp.float32)
    b2d = b.reshape(1, OUT_FEATURES).astype(jnp.float32)

    tb = _choose_batch_tile(batch)
    b_pad = _round_up(batch, tb)
    # Ragged tail pad (if any) is < one tile, not a full second pass over x.
    xp = x2d if b_pad == batch else jnp.pad(x2d, ((0, b_pad - batch), (0, 0)))

    grid = (b_pad // tb,)
    cost = pl.CostEstimate(
        flops=2 * b_pad * IN_FEATURES * OUT_FEATURES,
        transcendentals=0,
        bytes_accessed=(
            b_pad * IN_FEATURES * 4            # x stream (dominant)
            + IN_FEATURES * OUT_FEATURES * 4   # resident weight
            + OUT_FEATURES * 4                 # bias
            + b_pad * OUT_FEATURES * 4         # narrow output writeback
        ),
    )

    out = pl.pallas_call(
        linear_kernel,
        out_shape=jax.ShapeDtypeStruct((b_pad, OUT_FEATURES), jnp.float32),
        grid=grid,
        in_specs=[
            pl.BlockSpec((tb, IN_FEATURES), lambda i: (i, 0)),            # batch-tiled x
            pl.BlockSpec((IN_FEATURES, OUT_FEATURES), lambda i: (0, 0)),  # resident W
            pl.BlockSpec((1, OUT_FEATURES), lambda i: (0, 0)),            # resident b
        ],
        out_specs=pl.BlockSpec((tb, OUT_FEATURES), lambda i: (i, 0)),
        compiler_params=pltpu.CompilerParams(
            dimension_semantics=("parallel",),   # megacore split on v7x
        ),
        cost_estimate=cost,
    )(xp, w2d, b2d)

    return out if b_pad == batch else out[:batch]


def init_params(key):
    # Deterministic init mimicking torch.nn.Linear default:
    # U(-1/sqrt(in_features), 1/sqrt(in_features)).
    in_features, out_features = IN_FEATURES, OUT_FEATURES
    k_w, k_b = jax.random.split(key)
    bound = 1.0 / jnp.sqrt(jnp.float32(in_features))
    # torch stores weight as (out, in); we keep the transposed (in, out) layout.
    w = jax.random.uniform(
        k_w, (in_features, out_features), jnp.float32, minval=-bound, maxval=bound
    )
    b = jax.random.uniform(
        k_b, (out_features,), jnp.float32, minval=-bound, maxval=bound
    )
    return w, b


if __name__ == "__main__":
    key = jax.random.PRNGKey(0)
    k_x, k_p = jax.random.split(key)

    # Small MNIST-like batch: (B=2, C=1, H=28, W=28), NCHW as in PyTorch.
    x = jax.random.normal(k_x, (2, 1, 28, 28), jnp.float32)
    w, b = init_params(k_p)

    out = jax.block_until_ready(simple_net_forward(x, w, b))

    # Sanity check against a plain-JAX reference at matching (true f32) precision.
    ref = jnp.dot(
        x.reshape(-1, IN_FEATURES), w, precision=jax.lax.Precision.HIGHEST
    ) + b
    assert out.shape == (2, 10)
    assert jnp.allclose(out, ref, atol=1e-4, rtol=1e-4)

    print("KERNEL_OK")
</pallas_src>

<mosaic_0001>
module attributes {stable_mosaic.version = 11 : i64} {
  func.func @linear_kernel(%arg0: i32, %arg1: memref<2x784xf32, #tpu.memory_space<vmem>>, %arg2: memref<784x10xf32, #tpu.memory_space<vmem>>, %arg3: memref<1x10xf32, #tpu.memory_space<vmem>>, %arg4: memref<2x10xf32, #tpu.memory_space<vmem>>) attributes {dimension_semantics = [#tpu.dimension_semantics<parallel>], iteration_bounds = array<i64: 1>, scalar_prefetch = 0 : i64, scratch_operands = 0 : i64, tpu.core_type = #tpu.core_type<tc>, window_params = [{transform_indices = @transform_0, window_bounds = array<i64: 2, 784>}, {pipeline_mode = #tpu.pipeline_mode<synchronous>, transform_indices = @transform_1, window_bounds = array<i64: 784, 10>}, {pipeline_mode = #tpu.pipeline_mode<synchronous>, transform_indices = @transform_2, window_bounds = array<i64: 1, 10>}, {transform_indices = @transform_3, window_bounds = array<i64: 2, 10>}]} {
    %c0 = arith.constant 0 : index
    %c0_0 = arith.constant 0 : index
    %0 = vector.load %arg1[%c0, %c0_0] : memref<2x784xf32, #tpu.memory_space<vmem>>, vector<2x784xf32>
    %c0_1 = arith.constant 0 : index
    %c0_2 = arith.constant 0 : index
    %1 = vector.load %arg2[%c0_1, %c0_2] : memref<784x10xf32, #tpu.memory_space<vmem>>, vector<784x10xf32>
    %cst = arith.constant dense<0.000000e+00> : vector<2x10xf32>
    %2 = tpu.matmul %0, %1, %cst {dimension_numbers = #tpu.dot_dimension_numbers<[1], [0], [0], [1], [0, 0, 1, 1], [], []>, precision = #tpu.contract_precision<fp32>} : vector<2x784xf32>, vector<784x10xf32>, vector<2x10xf32> -> vector<2x10xf32>
    %c0_3 = arith.constant 0 : index
    %c0_4 = arith.constant 0 : index
    %3 = vector.load %arg3[%c0_3, %c0_4] : memref<1x10xf32, #tpu.memory_space<vmem>>, vector<1x10xf32>
    %4 = vector.broadcast %3 : vector<1x10xf32> to vector<2x10xf32>
    %5 = arith.addf %2, %4 : vector<2x10xf32>
    %c0_5 = arith.constant 0 : index
    %c0_6 = arith.constant 0 : index
    %6 = vector.load %arg4[%c0_5, %c0_6] : memref<2x10xf32, #tpu.memory_space<vmem>>, vector<2x10xf32>
    tpu.vector_store %arg4[%c0_5, %c0_6], %5 {strides = array<i32>} : memref<2x10xf32, #tpu.memory_space<vmem>>, vector<2x10xf32>,
    return
  }
  func.func @transform_0(%arg0: i32) -> (i32, i32) {
    %c0_i32 = arith.constant 0 : i32
    %c0_i32_0 = arith.constant 0 : i32
    return %arg0, %c0_i32 : i32, i32
  }
  func.func @transform_1(%arg0: i32) -> (i32, i32) {
    %c0_i32 = arith.constant 0 : i32
    %c0_i32_0 = arith.constant 0 : i32
    %c0_i32_1 = arith.constant 0 : i32
    return %c0_i32, %c0_i32_0 : i32, i32
  }
  func.func @transform_2(%arg0: i32) -> (i32, i32) {
    %c0_i32 = arith.constant 0 : i32
    %c0_i32_0 = arith.constant 0 : i32
    %c0_i32_1 = arith.constant 0 : i32
    return %c0_i32, %c0_i32_0 : i32, i32
  }
  func.func @transform_3(%arg0: i32) -> (i32, i32) {
    %c0_i32 = arith.constant 0 : i32
    %c0_i32_0 = arith.constant 0 : i32
    return %arg0, %c0_i32 : i32, i32
  }
}

</mosaic_0001>

<bundles_post_ra>
// kernel: tpu_custom_call.1
= control target key start
LH: loop header
LB: loop body
LE: loop exit
PB: predicated region body
PF: predicated region fallthrough
CT: control target
= control target key end

     0   :  { %s4244_s0 = inlined_call_operand.vmem [shape: f32[2,784], index: 0, kind: input, shape index: {}]   ;;  %s4245_s1 = inlined_call_operand.vmem [shape: f32[784,10], index: 1, kind: input, shape index: {}]   ;;  %s4246_s2 = inlined_call_operand.vmem [shape: f32[1,10], index: 2, kind: input, shape index: {}]   ;;  %s4247_s3 = inlined_call_operand.hbm [shape: f32[2,10], index: 3, kind: output, shape index: {}]  }
   0x1   :  { %v32_v0 = vld [vmem:[%s4245_s1 + $0x78] sm:$0xff]  ;;  %v31_v1 = vld [vmem:[%s4245_s1 + $0x70] sm:$0xff]  ;;  %v30_v2 = vld [vmem:[%s4245_s1 + $0x68] sm:$0xff] }
   0x2   :  { %v2421_v3 = vand.u32 4294901760, %v32_v0  ;;  %v2423_v4 = vand.u32 4294901760, %v31_v1  ;;  %v2425_v5 = vand.u32 4294901760, %v30_v2  ;;  %v29_v6 = vld [vmem:[%s4245_s1 + $0x60] sm:$0xff]  ;;  %v28_v7 = vld [vmem:[%s4245_s1 + $0x58] sm:$0xff]  ;;  %v27_v8 = vld [vmem:[%s4245_s1 + $0x50] sm:$0xff] }
   0x3   :  { %v2436_v9 = vand.u32 4294901760, %v29_v6  ;;  %v2438_v10 = vand.u32 4294901760, %v28_v7  ;;  %v2440_v11 = vand.u32 4294901760, %v27_v8  ;;  %v26_v12 = vld [vmem:[%s4245_s1 + $0x48] sm:$0xff]  ;;  %v25_v13 = vld [vmem:[%s4245_s1 + $0x40] sm:$0xff]  ;;  %v24_v21 = vld [vmem:[%s4245_s1 + $0x38] sm:$0xff] }
   0x4   :  { %141 = vmatpush.msra.mxu0 %v2421_v3  ;;  %v2450_v14 = vsub.f32 %v32_v0, %v2421_v3  ;;  %v2453_v15 = vsub.f32 %v31_v1, %v2423_v4  ;;  %337 = vmatpush.msra.mxu3 %v2421_v3  ;;  %v2457_v16 = vsub.f32 %v30_v2, %v2425_v5  ;;  %v2459_v17 = vand.u32 4294901760, %v26_v12  ;;  %v23_v26 = vld [vmem:[%s4245_s1 + $0x30] sm:$0xff]  ;;  %v22_v36 = vld [vmem:[%s4245_s1 + $0x28] sm:$0xff] }
   0x5   :  { %v2462_v18 = vsub.f32 %v29_v6, %v2436_v9  ;;  %v2465_v19 = vsub.f32 %v28_v7, %v2438_v10  ;;  %v2468_v20 = vsub.f32 %v27_v8, %v2440_v11  ;;  %v2478_v25 = vand.u32 4294901760, %v25_v13 }
   0x6   :  { %143 = vmatpush.msra.mxu0 %v2423_v4  ;;  %284 = vmatpush.msra.mxu2 %v2450_v14  ;;  %v183_v22 = vand.u32 4294901760, %v2450_v14  ;;  %v4263_v23 = vand.u32 4294901760, %v2453_v15  ;;  %v4261_v24 = vand.u32 4294901760, %v2457_v16  ;;  %v2487_v29 = vsub.f32 %v26_v12, %v2459_v17 }
   0x7   :  { %339 = vmatpush.msra.mxu3 %v2423_v4  ;;  %v4260_v27 = vand.u32 4294901760, %v2462_v18  ;;  %v4257_v28 = vand.u32 4294901760, %v2465_v19  ;;  %v2500_v33 = vand.u32 4294901760, %v24_v21  ;;  %v2503_v34 = vand.u32 4294901760, %v23_v26 }
   0x8   :  { %145 = vmatpush.msra.mxu0 %v2425_v5  ;;  %287 = vmatpush.msra.mxu2 %v2453_v15  ;;  %v184_v30 = vsub.f32 %v2450_v14, %v183_v22  ;;  %v190_v31 = vsub.f32 %v2453_v15, %v4263_v23  ;;  %v196_v32 = vsub.f32 %v2457_v16, %v4261_v24  ;;  %v4255_v35 = vand.u32 4294901760, %v2468_v20 }
   0x9   :  { %341 = vmatpush.msra.mxu3 %v2425_v5 }
   0xa   :  { %8 = vsyncpa [#allocation3], 0  ;;  %147 = vmatpush.msra.mxu0 %v2436_v9  ;;  %v185_v37 = vand.u32 4294901760, %v184_v30  ;;  %290 = vmatpush.msra.mxu2 %v2457_v16  ;;  %v191_v38 = vand.u32 4294901760, %v190_v31  ;;  %v202_v39 = vsub.f32 %v2462_v18, %v4260_v27  ;;  %v2515_v40 = vsub.f32 %v25_v13, %v2478_v25  ;;  %v21_v42 = vld [vmem:[%s4245_s1 + $0x20] sm:$0xff]  ;;  %v20_v47 = vld [vmem:[%s4245_s1 + $0x18] sm:$0xff] }
   0xb   :  { %343 = vmatpush.msra.mxu3 %v2436_v9  ;;  %v208_v41 = vsub.f32 %v2465_v19, %v4257_v28  ;;  %v197_v43 = vand.u32 4294901760, %v196_v32  ;;  %v2525_v44 = vand.u32 4294901760, %v22_v36  ;;  %v4254_v45 = vand.u32 4294901760, %v2487_v29  ;;  %v19_v54 = vld [vmem:[%s4245_s1 + $0x10] sm:$0xff]  ;;  %v15_v55 = vld [vmem:[%s4244_s0] sm:$0xff]  ;;  %v48_v60 = vld [vmem:[%s4245_s1 + $0xf8] sm:$0xff] }
   0xc   :  { %149 = vmatpush.msra.mxu0 %v2438_v10  ;;  %186 = vmatpush.msra.mxu1 %v185_v37  ;;  %v2529_v46 = vsub.f32 %v24_v21, %v2500_v33  ;;  %v214_v48 = vsub.f32 %v2468_v20, %v4255_v35  ;;  %v203_v49 = vand.u32 4294901760, %v202_v39  ;;  %v2540_v50 = vand.u32 4294901760, %v21_v42  ;;  %121 = vst [vmem:[#allocation1] ss:$4 sm:$0xff] %v15_v55  ;;  %v18_v62 = vld [vmem:[%s4245_s1 + $0x8] sm:$0xff]  ;;  %v17_v6 = vld [vmem:[%s4245_s1] sm:$0xff] }
   0xd   :  { %293 = vmatpush.msra.mxu2 %v2462_v18  ;;  %345 = vmatpush.msra.mxu3 %v2438_v10  ;;  %v4253_v51 = vand.u32 4294901760, %v2515_v40  ;;  %v2544_v52 = vsub.f32 %v23_v26, %v2503_v34  ;;  %v2548_v53 = vand.u32 4294901760, %v20_v47  ;;  %v209_v56 = vand.u32 4294901760, %v208_v41  ;;  %v47_v7 = vld [vmem:[%s4245_s1 + $0xf0] sm:$0xff]  ;;  %s2354_s24 = sshll.u32 %s4247_s3, 4  ;;  %s2355_s24 = int_to_ptr.hbm [resolvable:$true] %s2354_s24 }
   0xe   :  { %151 = vmatpush.msra.mxu0 %v2440_v11  ;;  %192 = vmatpush.msra.mxu1 %v191_v38  ;;  %v220_v57 = vsub.f32 %v2487_v29, %v4254_v45  ;;  %v4252_v58 = vand.u32 4294901760, %v2529_v46  ;;  %v2562_v59 = vsub.f32 %v22_v36, %v2525_v44  ;;  %v215_v61 = vand.u32 4294901760, %v214_v48  ;;  %v46_v36 = vld [vmem:[%s4245_s1 + $0xe8] sm:$0xff]  ;;  %v41_v45 = vld [vmem:[%s4245_s1 + $0xc0] sm:$0xff] }
   0xf   :  { %296 = vmatpush.msra.mxu2 %v2465_v19  ;;  %347 = vmatpush.msra.mxu3 %v2440_v11  ;;  %v226_v63 = vsub.f32 %v2515_v40, %v4253_v51  ;;  %v2576_v0 = vand.u32 4294901760, %v19_v54  ;;  %v4251_v1 = vand.u32 4294901760, %v2544_v52  ;;  %v2580_v2 = vsub.f32 %v21_v42, %v2540_v50 }
  0x10   :  { %153 = vmatpush.msra.mxu0 %v2459_v17  ;;  %198 = vmatpush.msra.mxu1 %v197_v43  ;;  %v2591_v8 = vsub.f32 %v20_v47, %v2548_v53  ;;  %v2593_v12 = vand.u32 4294901760, %v48_v60  ;;  %v221_v13 = vand.u32 4294901760, %v220_v57  ;;  %v232_v21 = vsub.f32 %v2529_v46, %v4252_v58  ;;  %v45_v47 = vld [vmem:[%s4245_s1 + $0xe0] sm:$0xff] }
  0x11   :  { %299 = vmatpush.msra.mxu2 %v2468_v20  ;;  %349 = vmatpush.msra.mxu3 %v2459_v17  ;;  %v2599_v26 = vand.u32 4294901760, %v18_v62  ;;  %v4249_v30 = vand.u32 4294901760, %v2562_v59  ;;  %v2604_v31 = vand.u32 4294901760, %v17_v6  ;;  %v2606_v32 = vand.u32 4294901760, %v47_v7 }
  0x12   :  { %155 = vmatpush.msra.mxu0 %v2478_v25  ;;  %204 = vmatpush.msra.mxu1 %v203_v49  ;;  %v227_v37 = vand.u32 4294901760, %v226_v63  ;;  %v238_v38 = vsub.f32 %v2544_v52, %v4251_v1  ;;  %v4248_v39 = vand.u32 4294901760, %v2580_v2  ;;  %v2617_v41 = vsub.f32 %v19_v54, %v2576_v0 }
  0x13   :  { %302 = vmatpush.msra.mxu2 %v2487_v29  ;;  %351 = vmatpush.msra.mxu3 %v2478_v25  ;;  %v4250_v42 = vand.u32 4294901760, %v2591_v8  ;;  %v2623_v43 = vsub.f32 %v48_v60, %v2593_v12  ;;  %v233_v48 = vand.u32 4294901760, %v232_v21  ;;  %v244_v49 = vsub.f32 %v2562_v59, %v4249_v30  ;;  %v44_v60 = vld [vmem:[%s4245_s1 + $0xd8] sm:$0xff]  ;;  %v43_v21 = vld [vmem:[%s4245_s1 + $0xd0] sm:$0xff] }
  0x14   :  { %157 = vmatpush.msra.mxu0 %v2500_v33  ;;  %210 = vmatpush.msra.mxu1 %v209_v56  ;;  %v2633_v54 = vsub.f32 %v18_v62, %v2599_v26  ;;  %v2635_v55 = vand.u32 4294901760, %v46_v36  ;;  %v2640_v56 = vsub.f32 %v17_v6, %v2604_v31  ;;  %v2643_v57 = vsub.f32 %v47_v7, %v2606_v32 }
  0x15   :  { %305 = vmatpush.msra.mxu2 %v2515_v40  ;;  %353 = vmatpush.msra.mxu3 %v2500_v33  ;;  %v250_v62 = vsub.f32 %v2580_v2, %v4248_v39  ;;  %v4256_v63 = vand.u32 4294901760, %v2617_v41  ;;  %v256_v6 = vsub.f32 %v2591_v8, %v4250_v42  ;;  %v4258_v7 = vand.u32 4294901760, %v2623_v43 }
  0x16   :  { %159 = vmatpush.msra.mxu0 %v2503_v34  ;;  %216 = vmatpush.msra.mxu1 %v215_v61  ;;  %4318 = vst [vmem:[#allocation5_spill] sm:$0xff] %v2635_v55  ;;  %v239_v61 = vand.u32 4294901760, %v238_v38  ;;  %v4259_v38 = vand.u32 4294901760, %v2633_v54  ;;  %v2667_v39 = vsub.f32 %v46_v36, %v2635_v55  ;;  %v2669_v30 = vand.u32 4294901760, %v44_v60 }
  0x17   :  { %308 = vmatpush.msra.mxu2 %v2529_v46  ;;  %355 = vmatpush.msra.mxu3 %v2503_v34  ;;  %v4264_v42 = vand.u32 4294901760, %v2640_v56  ;;  %v4262_v1 = vand.u32 4294901760, %v2643_v57  ;;  %v262_v36 = vsub.f32 %v2617_v41, %v4256_v63  ;;  %v2685_v51 = vand.u32 4294901760, %v43_v21 }
  0x18   :  { %161 = vmatpush.msra.mxu0 %v2525_v44  ;;  %222 = vmatpush.msra.mxu1 %v221_v13  ;;  %v2653_v13 = vand.u32 4294901760, %v45_v47  ;;  %v257_v35 = vand.u32 4294901760, %v256_v6  ;;  %v2701_v63 = vsub.f32 %v44_v60, %v2669_v30  ;;  %v40_v6 = vld [vmem:[%s4245_s1 + $0xb8] sm:$0xff]  ;;  %vm137_vm0 = vcmask 130048  }
  0x19   :  { %311 = vmatpush.msra.mxu2 %v2544_v52  ;;  %357 = vmatpush.msra.mxu3 %v2525_v44  ;;  %v263_v60 = vand.u32 4294901760, %v262_v36  ;;  %v2721_v24 = vsub.f32 %v43_v21, %v2685_v51  ;;  %v2726_v23 = vand.u32 4294901760, %v40_v6  ;;  %vm2345_vm1 = vcmask 74752  }
  0x1a   :  { %163 = vmatpush.msra.mxu0 %v2540_v50  ;;  %228 = vmatpush.msra.mxu1 %v227_v37  ;;  %v245_v37 = vand.u32 4294901760, %v244_v49  ;;  %v251_v49 = vand.u32 4294901760, %v250_v62  ;;  %v2683_v58 = vsub.f32 %v45_v47, %v2653_v13  ;;  %v268_v47 = vsub.f32 %v2633_v54, %v4259_v38 }
  0x1b   :  { %314 = vmatpush.msra.mxu2 %v2562_v59  ;;  %359 = vmatpush.msra.mxu3 %v2540_v50  ;;  %v4265_v62 = vand.u32 4294901760, %v2667_v39  ;;  %v274_v38 = vsub.f32 %v2640_v56, %v4264_v42  ;;  %v4267_v14 = vand.u32 4294901760, %v2701_v63 }
  0x1c   :  { %165 = vmatpush.msra.mxu0 %v2548_v53  ;;  %234 = vmatpush.msra.mxu1 %v233_v48  ;;  %v42_v48 = vld [vmem:[%s4245_s1 + $0xc8] sm:$0xff]  ;;  %v4266_v27 = vand.u32 4294901760, %v2683_v58  ;;  %v269_v36 = vand.u32 4294901760, %v268_v47 }
  0x1d   :  { %317 = vmatpush.msra.mxu2 %v2580_v2  ;;  %361 = vmatpush.msra.mxu3 %v2548_v53  ;;  %v2703_v28 = vand.u32 4294901760, %v42_v48  ;;  %v537_v21 = vsub.f32 %v2667_v39, %v4265_v62  ;;  %v38_v47 = vld [vmem:[%s4245_s1 + $0xa8] sm:$0xff]  ;;  %v275_v62 = vand.u32 4294901760, %v274_v38 }
  0x1e   :  { %167 = vmatpush.msra.mxu0 %v2576_v0  ;;  %240 = vmatpush.msra.mxu1 %v239_v61  ;;  %v525_v61 = vsub.f32 %v2623_v43, %v4258_v7  ;;  %v2713_v7 = vand.u32 4294901760, %v41_v45 }
  0x1f   :  { %320 = vmatpush.msra.mxu2 %v2591_v8  ;;  %363 = vmatpush.msra.mxu3 %v2576_v0  ;;  %v538_v38 = vand.u32 4294901760, %v537_v21 }
  0x20   :  { %169 = vmatpush.msra.mxu0 %v2599_v26  ;;  %246 = vmatpush.msra.mxu1 %v245_v37  ;;  %v531_v37 = vsub.f32 %v2643_v57, %v4262_v1  ;;  %v526_v1 = vand.u32 4294901760, %v525_v61  ;;  %v4319_v61 = vand.u32 4294901760, %v2453_v15 }
  0x21   :  { %323 = vmatpush.msra.mxu2 %v2617_v41  ;;  %365 = vmatpush.msra.mxu3 %v2599_v26 }
  0x22   :  { %171 = vmatpush.msra.mxu0 %v2604_v31  ;;  %252 = vmatpush.msra.mxu1 %v251_v49  ;;  %v39_v49 = vld [vmem:[%s4245_s1 + $0xb0] sm:$0xff]  ;;  %v532_v42 = vand.u32 4294901760, %v531_v37  ;;  %v4320_v37 = vand.u32 4294901760, %v2457_v16  ;;  %v2768_v16 = vand.u32 4294901760, %v38_v47 }
  0x23   :  { %326 = vmatpush.msra.mxu2 %v2633_v54  ;;  %367 = vmatpush.msra.mxu3 %v2604_v31 }
  0x24   :  { %378 = vmatpush.msrb.mxu0 %v183_v22  ;;  %258 = vmatpush.msra.mxu1 %v257_v35  ;;  %v2737_v22 = vsub.f32 %v42_v48, %v2703_v28  ;;  %v2743_v35 = vsub.f32 %v41_v45, %v2713_v7  ;;  %v543_v48 = vsub.f32 %v2683_v58, %v4266_v27 }
  0x25   :  { %329 = vmatpush.msra.mxu2 %v2640_v56  ;;  %527 = vmatpush.msrb.mxu3 %v526_v1  ;;  %v2758_v45 = vsub.f32 %v40_v6, %v2726_v23  ;;  %v549_v27 = vsub.f32 %v2701_v63, %v4267_v14  ;;  %v4321_v1 = vand.u32 4294901760, %v2462_v18 }
  0x26   :  { %382 = vmatpush.msrb.mxu0 %v4319_v61  ;;  %264 = vmatpush.msra.mxu1 %v263_v60  ;;  %v2753_v61 = vand.u32 4294901760, %v39_v49  ;;  %v37_v60 = vld [vmem:[%s4245_s1 + $0xa0] sm:$0xff]  ;;  %v544_v21 = vand.u32 4294901760, %v543_v48  ;;  %v4324_v6 = vand.u32 4294901760, %v2737_v22 }
  0x27   :  { %482 = vmatpush.msrb.mxu2 %v2593_v12  ;;  %533 = vmatpush.msrb.mxu3 %v532_v42  ;;  %v2783_v18 = vand.u32 4294901760, %v37_v60  ;;  %v4323_v42 = vand.u32 4294901760, %v2465_v19  ;;  %v550_v48 = vand.u32 4294901760, %v549_v27  ;;  %v4325_v19 = vand.u32 4294901760, %v2468_v20  ;;  %v35_v27 = vld [vmem:[%s4245_s1 + $0x90] sm:$0xff] }
  0x28   :  { %386 = vmatpush.msrb.mxu0 %v4320_v37  ;;  %270 = vmatpush.msra.mxu1 %v269_v36  ;;  %v36_v36 = vld [vmem:[%s4245_s1 + $0x98] sm:$0xff]  ;;  %v4322_v37 = vand.u32 4294901760, %v2721_v24  ;;  %v2781_v15 = vsub.f32 %v39_v49, %v2753_v61  ;;  %v2794_v49 = vsub.f32 %v38_v47, %v2768_v16 }
  0x29   :  { %484 = vmatpush.msrb.mxu2 %v2606_v32  ;;  %539 = vmatpush.msrb.mxu3 %v538_v38 }
  0x2a   :  { %390 = vmatpush.msrb.mxu0 %v4321_v1  ;;  %276 = vmatpush.msra.mxu1 %v275_v62  ;;  %v555_v14 = vsub.f32 %v2721_v24, %v4322_v37  ;;  %v4270_v1 = vand.u32 4294901760, %v2758_v45  ;;  %v124_v62 = vld.sshfl [vmem:[#allocation1] sm:$0xff pattern:$0x73625140]  ;;  %v561_v37 = vsub.f32 %v2737_v22, %v4324_v6  ;;  %v4271_v38 = vand.u32 4294901760, %v2781_v15 }
  0x2b   :  { %486 = vmatpush.msrb.mxu2 %v2635_v55  ;;  %v2796_v55 = vand.u32 4294901760, %v36_v36  ;;  %545 = vmatpush.msrb.mxu3 %v544_v21  ;;  %v2810_v6 = vsub.f32 %v37_v60, %v2783_v18  ;;  %v2812_v20 = vand.u32 4294901760, %v124_v62  ;;  %v584_v21 = vand.u32 4294901760, %v2794_v49 }
  0x2c   :  { %394 = vmatpush.msrb.mxu0 %v4323_v42  ;;  %445 = vmatpush.msrb.mxu1 %v2421_v3  ;;  %v4326_v3 = vand.u32 4294901760, %v2743_v35  ;;  %v556_v47 = vand.u32 4294901760, %v555_v14  ;;  %v34_v14 = vld [vmem:[%s4245_s1 + $0x88] sm:$0xff]  ;;  %v562_v60 = vand.u32 4294901760, %v561_v37 }
  0x2d   :  { %488 = vmatpush.msrb.mxu2 %v2653_v13  ;;  %551 = vmatpush.msrb.mxu3 %v550_v48  ;;  %v579_v48 = vsub.f32 %v2781_v15, %v4271_v38  ;;  %v2842_v37 = vsub.f32 %v124_v62, %v2812_v20 }
  0x2e   :  { %398 = vmatpush.msrb.mxu0 %v4325_v19  ;;  %447 = vmatpush.msrb.mxu1 %v2423_v4  ;;  %v567_v42 = vsub.f32 %v2743_v35, %v4326_v3  ;;  %v4327_v4 = vand.u32 4294901760, %v2487_v29  ;;  %v573_v19 = vsub.f32 %v2758_v45, %v4270_v1  ;;  %v2825_v3 = vand.u32 4294901760, %v35_v27  ;;  %v33_v1 = vld [vmem:[%s4245_s1 + $0x80] sm:$0xff] }
  0x2f   :  { %490 = vmatpush.msrb.mxu2 %v2669_v30  ;;  %v2828_v29 = vsub.f32 %v36_v36, %v2796_v55  ;;  %557 = vmatpush.msrb.mxu3 %v556_v47  ;;  %v590_v36 = vand.u32 4294901760, %v2810_v6  ;;  %v585_v47 = vsub.f32 %v2794_v49, %v584_v21  ;;  %v2857_v38 = vand.u32 4294901760, %v33_v1 }
  0x30   :  { %402 = vmatpush.msrb.mxu0 %v4327_v4  ;;  %449 = vmatpush.msrb.mxu1 %v2425_v5  ;;  %v4328_v5 = vand.u32 4294901760, %v2515_v40  ;;  %v568_v4 = vand.u32 4294901760, %v567_v42  ;;  %v2844_v40 = vand.u32 4294901760, %v34_v14  ;;  %v574_v42 = vand.u32 4294901760, %v573_v19 }
  0x31   :  { %492 = vmatpush.msrb.mxu2 %v2685_v51  ;;  %563 = vmatpush.msrb.mxu3 %v562_v60  ;;  %v2855_v62 = vsub.f32 %v35_v27, %v2825_v3  ;;  %v591_v19 = vsub.f32 %v2810_v6, %v590_v36  ;;  %v174_v60 = vand.u32 4294901760, %v2842_v37 }
  0x32   :  { %406 = vmatpush.msrb.mxu0 %v4328_v5  ;;  %451 = vmatpush.msrb.mxu1 %v2436_v9  ;;  %v4329_v9 = vand.u32 4294901760, %v2529_v46  ;;  %v596_v5 = vand.u32 4294901760, %v2828_v29  ;;  %v4330_v46 = vand.u32 4294901760, %v2544_v52  ;;  %v2868_v27 = vsub.f32 %v34_v14, %v2844_v40 }
  0x33   :  { %494 = vmatpush.msrb.mxu2 %v2703_v28  ;;  %569 = vmatpush.msrb.mxu3 %v568_v4  ;;  %v602_v4 = vand.u32 4294901760, %v2855_v62  ;;  %v4332_v14 = vand.u32 4294901760, %v2580_v2 }
  0x34   :  { %410 = vmatpush.msrb.mxu0 %v4329_v9  ;;  %453 = vmatpush.msrb.mxu1 %v2438_v10  ;;  %v580_v10 = vand.u32 4294901760, %v579_v48  ;;  %v4331_v9 = vand.u32 4294901760, %v2562_v59  ;;  %v597_v52 = vsub.f32 %v2828_v29, %v596_v5  ;;  %v2879_v48 = vsub.f32 %v33_v1, %v2857_v38  ;;  %v125_v59 = vld.sshfl [vmem:[#allocation1 + $0x8] sm:$0xff pattern:$0x73625140] }
  0x35   :  { %496 = vmatpush.msrb.mxu2 %v2713_v7  ;;  %575 = vmatpush.msrb.mxu3 %v574_v42  ;;  %v175_v42 = vsub.f32 %v2842_v37, %v174_v60 }
  0x36   :  { %414 = vmatpush.msrb.mxu0 %v4330_v46  ;;  %455 = vmatpush.msrb.mxu1 %v2440_v11  ;;  %v586_v11 = vand.u32 4294901760, %v585_v47  ;;  %v608_v47 = vand.u32 4294901760, %v2868_v27  ;;  %v4333_v46 = vand.u32 4294901760, %v2591_v8  ;;  %v598_v2 = vand.u32 4294901760, %v597_v52 }
  0x37   :  { %498 = vmatpush.msrb.mxu2 %v2726_v23  ;;  %581 = vmatpush.msrb.mxu3 %v580_v10  ;;  %v614_v1 = vand.u32 4294901760, %v2879_v48  ;;  %v2895_v10 = vand.u32 4294901760, %v125_v59  ;;  %v4336_v52 = vand.u32 4294901760, %v2640_v56  ;;  %v4340_v56 = vand.u32 4294901760, %v2683_v58 }
  0x38   :  { %418 = vmatpush.msrb.mxu0 %v4331_v9  ;;  %457 = vmatpush.msrb.mxu1 %v2459_v17  ;;  %v592_v17 = vand.u32 4294901760, %v591_v19  ;;  %v4334_v19 = vand.u32 4294901760, %v2617_v41  ;;  %v609_v8 = vsub.f32 %v2868_v27, %v608_v47  ;;  %v4335_v9 = vand.u32 4294901760, %v2633_v54 }
  0x39   :  { %500 = vmatpush.msrb.mxu2 %v2753_v61  ;;  %587 = vmatpush.msrb.mxu3 %v586_v11  ;;  %v2912_v11 = vsub.f32 %v125_v59, %v2895_v10 }
  0x3a   :  { %422 = vmatpush.msrb.mxu0 %v4332_v14  ;;  %459 = vmatpush.msrb.mxu1 %v2478_v25  ;;  %v603_v25 = vsub.f32 %v2855_v62, %v602_v4 }
  0x3b   :  { %502 = vmatpush.msrb.mxu2 %v2768_v16  ;;  %593 = vmatpush.msrb.mxu3 %v592_v17  ;;  %v515_v14 = vand.u32 4294901760, %v2912_v11  ;;  %v55_v17 = vld [vmem:[%s4245_s1 + $0x130] sm:$0xff] }
  0x3c   :  { %426 = vmatpush.msrb.mxu0 %v4333_v46  ;;  %461 = vmatpush.msrb.mxu1 %v2500_v33  ;;  %v176_v33 = vand.u32 4294901760, %v175_v42  ;;  %v604_v41 = vand.u32 4294901760, %v603_v25  ;;  %v54_v25 = vld [vmem:[%s4245_s1 + $0x128] sm:$0xff] }
  0x3d   :  { %504 = vmatpush.msrb.mxu2 %v2783_v18  ;;  %599 = vmatpush.msrb.mxu3 %v598_v2 }
  0x3e   :  { %430 = vmatpush.msrb.mxu0 %v4334_v19  ;;  %463 = vmatpush.msrb.mxu1 %v2503_v34  ;;  %v615_v34 = vsub.f32 %v2879_v48, %v614_v1  ;;  %v3113_v19 = vand.u32 4294901760, %v55_v17 }
  0x3f   :  { %506 = vmatpush.msrb.mxu2 %v2796_v55  ;;  %177 = vmatmul.f32.vlgmr.msra.gmra.mxu0 %v176_v33 }
  0x40   :  { %434 = vmatpush.msrb.mxu0 %v4335_v9  ;;  %465 = vmatpush.msrb.mxu1 %v2525_v44  ;;  %v610_v44 = vand.u32 4294901760, %v609_v8  ;;  %v616_v54 = vand.u32 4294901760, %v615_v34  ;;  %v53_v8 = vld [vmem:[%s4245_s1 + $0x120] sm:$0xff] }
  0x41   :  { %508 = vmatpush.msrb.mxu2 %v2825_v3  ;;  %605 = vmatpush.msrb.mxu3 %v604_v41  ;;  %v3128_v41 = vand.u32 4294901760, %v54_v25 }
  0x42   :  { %438 = vmatpush.msrb.mxu0 %v4336_v52  ;;  %467 = vmatpush.msrb.mxu1 %v2540_v50  ;;  %v4337_v50 = vand.u32 4294901760, %v2623_v43  ;;  %v126_v52 = vld.sshfl [vmem:[#allocation1 + $0x10] sm:$0xff pattern:$0x73625140] }
  0x43   :  { %510 = vmatpush.msrb.mxu2 %v2844_v40  ;;  %611 = vmatpush.msrb.mxu3 %v610_v44 }
  0x44   :  { %625 = vmatpush.msra.mxu0 %v2623_v43  ;;  %469 = vmatpush.msrb.mxu1 %v2548_v53  ;;  %v516_v53 = vsub.f32 %v2912_v11, %v515_v14 }
  0x45   :  { %512 = vmatpush.msrb.mxu2 %v2857_v38  ;;  %617 = vmatpush.msrb.mxu3 %v616_v54  ;;  %v52_v54 = vld [vmem:[%s4245_s1 + $0x118] sm:$0xff] }
  0x46   :  { %628 = vmatpush.msra.mxu0 %v2643_v57  ;;  %471 = vmatpush.msrb.mxu1 %v2576_v0  ;;  %v4338_v0 = vand.u32 4294901760, %v2643_v57  ;;  %v517_v43 = vand.u32 4294901760, %v516_v53  ;;  %v4347_v57 = vand.u32 4294901760, %v2781_v15 }
  0x47   :  { %332 = vmatmul.f32.vlgmr.msra.gmra.mxu2 %v2842_v37  ;;  %371 = vmatmul.f32.vlgmr.msra.gmra.mxu3 %v174_v60  ;;  %v56_v60 = vld [vmem:[%s4245_s1 + $0x138] sm:$0xff] }
  0x48   :  { %631 = vmatpush.msra.mxu0 %v2667_v39  ;;  %719 = vmatpush.msra.mxu2 %v4337_v50  ;;  %v3097_v46 = vand.u32 4294901760, %v56_v60  ;;  %v3143_v50 = vand.u32 4294901760, %v53_v8 }
  0x49   :  { %473 = vmatpush.msrb.mxu1 %v2599_v26  ;;  %786 = vmatpush.msra.mxu3 %v2593_v12  ;;  %v4339_v26 = vand.u32 4294901760, %v2667_v39  ;;  %v4342_v39 = vand.u32 4294901760, %v2701_v63 }
  0x4a   :  { %634 = vmatpush.msra.mxu0 %v2683_v58  ;;  %723 = vmatpush.msra.mxu2 %v4338_v0  ;;  %v4343_v58 = vand.u32 4294901760, %v2721_v24  ;;  %v3147_v0 = vsub.f32 %v55_v17, %v3113_v19 }
  0x4b   :  { %475 = vmatpush.msrb.mxu1 %v2604_v31  ;;  %788 = vmatpush.msra.mxu3 %v2606_v32  ;;  %v4341_v31 = vld [vmem:[#allocation5_spill] sm:$0xff] }
  0x4c   :  { %637 = vmatpush.msra.mxu0 %v2701_v63  ;;  %278 = vmatmul.f32.vlgmr.msra.gmra.mxu1 %v2812_v20  ;;  %v62_v63 = vld [vmem:[%s4245_s1 + $0x168] sm:$0xff] }
  0x4d   :  { %727 = vmatpush.msra.mxu2 %v4339_v26  ;;  %678 = vmatpush.msra.mxu1 %v2593_v12  ;;  %v4344_v12 = vand.u32 4294901760, %v2737_v22 }
  0x4e   :  { %640 = vmatpush.msra.mxu0 %v2721_v24  ;;  %790 = vmatpush.msra.mxu3 %v4341_v31  ;;  %v4345_v24 = vand.u32 4294901760, %v2743_v35 }
  0x4f   :  { %731 = vmatpush.msra.mxu2 %v4340_v56  ;;  %680 = vmatpush.msra.mxu1 %v2606_v32  ;;  %v4346_v32 = vand.u32 4294901760, %v2758_v45  ;;  %v3154_v56 = vand.u32 4294901760, %v126_v52 }
  0x50   :  { %518 = vmatmul.f32.vlgmr.msrb.gmra.mxu2 %v517_v43  ;;  %643 = vmatpush.msra.mxu0 %v2737_v22  ;;  %v51_v43 = vld [vmem:[%s4245_s1 + $0x110] sm:$0xff] }
  0x51   :  { %682 = vmatpush.msra.mxu1 %v4341_v31  ;;  %735 = vmatpush.msra.mxu2 %v4342_v39  ;;  %v3160_v39 = vand.u32 4294901760, %v52_v54 }
  0x52   :  { %792 = vmatpush.msra.mxu3 %v2653_v13  ;;  %440 = vmatmul.f32.vlgmr.msrb.gmra.mxu0 %v2812_v20 }
  0x53   :  { %619 = vmatmul.f32.vlgmr.msrb.gmra.mxu3 %v2895_v10  ;;  %646 = vmatpush.msra.mxu0 %v2743_v35  ;;  %v60_v35 = vld [vmem:[%s4245_s1 + $0x158] sm:$0xff] }
  0x54   :  { %684 = vmatpush.msra.mxu1 %v2653_v13  ;;  %739 = vmatpush.msra.mxu2 %v4343_v58 }
  0x55   :  { %794 = vmatpush.msra.mxu3 %v2669_v30  ;;  %477 = vmatmul.f32.vlgmr.msrb.gmra.mxu1 %v2812_v20 }
  0x56   :  { %649 = vmatpush.msra.mxu0 %v2758_v45  ;;  %686 = vmatpush.msra.mxu1 %v2669_v30  ;;  %v64_v30 = vld [vmem:[%s4245_s1 + $0x178] sm:$0xff]  ;;  %v59_v45 = vld [vmem:[%s4245_s1 + $0x150] sm:$0xff] }
  0x57   :  { %743 = vmatpush.msra.mxu2 %v4344_v12  ;;  %796 = vmatpush.msra.mxu3 %v2685_v51  ;;  %v3041_v20 = vand.u32 4294901760, %v59_v45  ;;  %v3164_v12 = vsub.f32 %v54_v25, %v3128_v41 }
  0x58   :  { %652 = vmatpush.msra.mxu0 %v2781_v15  ;;  %688 = vmatpush.msra.mxu1 %v2685_v51  ;;  %v63_v51 = vld [vmem:[%s4245_s1 + $0x170] sm:$0xff] }
  0x59   :  { %747 = vmatpush.msra.mxu2 %v4345_v24  ;;  %798 = vmatpush.msra.mxu3 %v2703_v28  ;;  %v2997_v13 = vand.u32 4294901760, %v63_v51 }
  0x5a   :  { %655 = vmatpush.msra.mxu0 %v2794_v49  ;;  %690 = vmatpush.msra.mxu1 %v2703_v28  ;;  %v2987_v28 = vand.u32 4294901760, %v64_v30  ;;  %v3030_v49 = vand.u32 4294901760, %v60_v35 }
  0x5b   :  { %751 = vmatpush.msra.mxu2 %v4346_v32  ;;  %800 = vmatpush.msra.mxu3 %v2713_v7  ;;  %v3172_v32 = vand.u32 4294901760, %v51_v43 }
  0x5c   :  { %658 = vmatpush.msra.mxu0 %v2810_v6  ;;  %692 = vmatpush.msra.mxu1 %v2713_v7  ;;  %v61_v7 = vld [vmem:[%s4245_s1 + $0x160] sm:$0xff]  ;;  %v3010_v22 = vsub.f32 %v64_v30, %v2987_v28 }
  0x5d   :  { %755 = vmatpush.msra.mxu2 %v4347_v57  ;;  %802 = vmatpush.msra.mxu3 %v2726_v23  ;;  %v3020_v15 = vand.u32 4294901760, %v61_v7  ;;  %v3176_v57 = vsub.f32 %v53_v8, %v3143_v50  ;;  %v3210_v25 = vsub.f32 %v51_v43, %v3172_v32 }
  0x5e   :  { %661 = vmatpush.msra.mxu0 %v2828_v29  ;;  %694 = vmatpush.msra.mxu1 %v2726_v23  ;;  %v3007_v23 = vand.u32 4294901760, %v62_v63 }
  0x5f   :  { %759 = vmatpush.msra.mxu2 %v584_v21  ;;  %804 = vmatpush.msra.mxu3 %v2753_v61  ;;  %v3051_v29 = vsub.f32 %v61_v7, %v3020_v15  ;;  %v3184_v7 = vsub.f32 %v126_v52, %v3154_v56 }
  0x60   :  { %664 = vmatpush.msra.mxu0 %v2855_v62  ;;  %696 = vmatpush.msra.mxu1 %v2753_v61  ;;  %v3023_v61 = vsub.f32 %v63_v51, %v2997_v13  ;;  %v3037_v6 = vsub.f32 %v62_v63, %v3007_v23  ;;  %v3073_v62 = vsub.f32 %v59_v45, %v3041_v20  ;;  %v4275_v51 = vand.u32 4294901760, %v3147_v0  ;;  %v50_v63 = vld [vmem:[%s4245_s1 + $0x108] sm:$0xff] }
  0x61   :  { %763 = vmatpush.msra.mxu2 %v590_v36  ;;  %806 = vmatpush.msra.mxu3 %v2768_v16  ;;  %v57_v36 = vld [vmem:[%s4245_s1 + $0x140] sm:$0xff] }
  0x62   :  { %667 = vmatpush.msra.mxu0 %v2868_v27  ;;  %698 = vmatpush.msra.mxu1 %v2768_v16  ;;  %v865_v16 = vand.u32 4294901760, %v3010_v22  ;;  %v871_v21 = vand.u32 4294901760, %v3023_v61  ;;  %v4280_v2 = vand.u32 4294901760, %v3073_v62 }
  0x63   :  { %767 = vmatpush.msra.mxu2 %v596_v5  ;;  %808 = vmatpush.msra.mxu3 %v2783_v18 }
  0x64   :  { %670 = vmatpush.msra.mxu0 %v2879_v48  ;;  %700 = vmatpush.msra.mxu1 %v2783_v18  ;;  %v58_v18 = vld [vmem:[%s4245_s1 + $0x148] sm:$0xff]  ;;  %v866_v37 = vsub.f32 %v3010_v22, %v865_v16  ;;  %v872_v27 = vsub.f32 %v3023_v61, %v871_v21  ;;  %v4285_v48 = vand.u32 4294901760, %v3051_v29  ;;  %v896_v44 = vsub.f32 %v3073_v62, %v4280_v2 }
  0x65   :  { %771 = vmatpush.msra.mxu2 %v602_v4  ;;  %810 = vmatpush.msra.mxu3 %v2796_v55  ;;  %v3067_v5 = vand.u32 4294901760, %v58_v18  ;;  %v3083_v4 = vand.u32 4294901760, %v57_v36 }
  0x66   :  { %673 = vmatmul.f32.vlgmr.msra.gmra.mxu0 %v2912_v11  ;;  %702 = vmatpush.msra.mxu1 %v2796_v55  ;;  %v3056_v55 = vsub.f32 %v60_v35, %v3030_v49  ;;  %v867_v42 = vand.u32 4294901760, %v866_v37  ;;  %v3132_v11 = vsub.f32 %v56_v60, %v3097_v46  ;;  %v897_v24 = vand.u32 4294901760, %v896_v44  ;;  %v80_v37 = vld [vmem:[%s4245_s1 + $0x1f8] sm:$0xff] }
  0x67   :  { %823 = vmatpush.msrb.mxu0 %v2987_v28  ;;  %775 = vmatpush.msra.mxu2 %v608_v47  ;;  %v3116_v33 = vsub.f32 %v57_v36, %v3083_v4  ;;  %v3192_v36 = vsub.f32 %v52_v54, %v3160_v39  ;;  %v3199_v60 = vand.u32 4294901760, %v50_v63 }
  0x68   :  { %812 = vmatpush.msra.mxu3 %v2825_v3  ;;  %704 = vmatpush.msra.mxu1 %v2825_v3  ;;  %v877_v3 = vand.u32 4294901760, %v3037_v6  ;;  %v4282_v59 = vand.u32 4294901760, %v3056_v55  ;;  %v4276_v58 = vand.u32 4294901760, %v3132_v11 }
  0x69   :  { %825 = vmatpush.msrb.mxu0 %v2997_v13  ;;  %779 = vmatpush.msra.mxu2 %v614_v1  ;;  %v873_v1 = vand.u32 4294901760, %v872_v27  ;;  %v4277_v53 = vand.u32 4294901760, %v3116_v33  ;;  %v49_v27 = vld [vmem:[%s4245_s1 + $0x100] sm:$0xff]  ;;  %v4274_v44 = vand.u32 4294901760, %v3192_v36  ;;  %v3230_v54 = vsub.f32 %v50_v63, %v3199_v60 }
  0x6a   :  { %814 = vmatpush.msra.mxu3 %v2844_v40  ;;  %781 = vmatmul.f32.vlgmr.msra.gmra.mxu2 %v2895_v10  ;;  %v878_v47 = vsub.f32 %v3037_v6, %v877_v3  ;;  %v914_v45 = vsub.f32 %v3132_v11, %v4276_v58  ;;  %v3224_v52 = vand.u32 4294901760, %v49_v27 }
  0x6b   :  { %827 = vmatpush.msrb.mxu0 %v3007_v23  ;;  %966 = vmatpush.msrb.mxu2 %v3010_v22  ;;  %v908_v30 = vsub.f32 %v3116_v33, %v4277_v53  ;;  %v72_v22 = vld [vmem:[%s4245_s1 + $0x1b8] sm:$0xff] }
  0x6c   :  { %706 = vmatpush.msra.mxu1 %v2844_v40  ;;  %816 = vmatpush.msra.mxu3 %v2857_v38  ;;  %v3100_v40 = vsub.f32 %v58_v18, %v3067_v5  ;;  %v879_v9 = vand.u32 4294901760, %v878_v47  ;;  %v4273_v18 = vand.u32 4294901760, %v3164_v12  ;;  %v4272_v47 = vand.u32 4294901760, %v3176_v57 }
  0x6d   :  { %818 = vmatmul.f32.vlgmr.msra.gmra.mxu3 %v2895_v10  ;;  %829 = vmatpush.msrb.mxu0 %v3020_v15  ;;  %v884_v10 = vsub.f32 %v3051_v29, %v4285_v48  ;;  %v909_v17 = vand.u32 4294901760, %v908_v30  ;;  %v915_v8 = vand.u32 4294901760, %v914_v45  ;;  %v77_v30 = vld [vmem:[%s4245_s1 + $0x1e0] sm:$0xff] }
  0x6e   :  { %969 = vmatpush.msrb.mxu2 %v3023_v61  ;;  %1019 = vmatpush.msrb.mxu3 %v2987_v28  ;;  %v4279_v34 = vand.u32 4294901760, %v3100_v40  ;;  %v932_v43 = vsub.f32 %v3176_v57, %v4272_v47  ;;  %v71_v61 = vld [vmem:[%s4245_s1 + $0x1b0] sm:$0xff] }
  0x6f   :  { %708 = vmatpush.msra.mxu1 %v2857_v38  ;;  %831 = vmatpush.msrb.mxu0 %v3030_v49  ;;  %v890_v38 = vsub.f32 %v3056_v55, %v4282_v59 }
  0x70   :  { %712 = vmatmul.f32.vlgmr.msra.gmra.mxu1 %v515_v14  ;;  %972 = vmatpush.msrb.mxu2 %v3037_v6  ;;  %v885_v14 = vand.u32 4294901760, %v884_v10  ;;  %v902_v31 = vsub.f32 %v3100_v40, %v4279_v34  ;;  %v3215_v10 = vand.u32 4294901760, %v80_v37 }
  0x71   :  { %868 = vmatpush.msrb.mxu1 %v867_v42  ;;  %1021 = vmatpush.msrb.mxu3 %v2997_v13  ;;  %v891_v26 = vand.u32 4294901760, %v890_v38  ;;  %v920_v42 = vsub.f32 %v3147_v0, %v4275_v51  ;;  %v79_v38 = vld [vmem:[%s4245_s1 + $0x1f0] sm:$0xff] }
  0x72   :  { %833 = vmatpush.msrb.mxu0 %v3041_v20  ;;  %975 = vmatpush.msrb.mxu2 %v3051_v29  ;;  %v903_v35 = vand.u32 4294901760, %v902_v31  ;;  %v4278_v31 = vand.u32 4294901760, %v3210_v25 }
  0x73   :  { %874 = vmatpush.msrb.mxu1 %v873_v1  ;;  %1023 = vmatpush.msrb.mxu3 %v3007_v23  ;;  %v856_v1 = vand.u32 4294901760, %v3184_v7 }
  0x74   :  { %835 = vmatpush.msrb.mxu0 %v3067_v5  ;;  %978 = vmatpush.msrb.mxu2 %v3056_v55 }
  0x75   :  { %880 = vmatpush.msrb.mxu1 %v879_v9  ;;  %1025 = vmatpush.msrb.mxu3 %v3020_v15  ;;  %v926_v9 = vsub.f32 %v3164_v12, %v4273_v18  ;;  %v857_v63 = vsub.f32 %v3184_v7, %v856_v1  ;;  %v76_v18 = vld [vmem:[%s4245_s1 + $0x1d8] sm:$0xff] }
  0x76   :  { %837 = vmatpush.msrb.mxu0 %v3083_v4  ;;  %981 = vmatpush.msrb.mxu2 %v3073_v62  ;;  %v3280_v53 = vand.u32 4294901760, %v76_v18 }
  0x77   :  { %886 = vmatpush.msrb.mxu1 %v885_v14  ;;  %1027 = vmatpush.msrb.mxu3 %v3030_v49  ;;  %v78_v14 = vld [vmem:[%s4245_s1 + $0x1e8] sm:$0xff]  ;;  %v927_v45 = vand.u32 4294901760, %v926_v9  ;;  %v933_v9 = vand.u32 4294901760, %v932_v43  ;;  %v858_v51 = vand.u32 4294901760, %v857_v63 }
  0x78   :  { %839 = vmatpush.msrb.mxu0 %v3097_v46  ;;  %984 = vmatpush.msrb.mxu2 %v3100_v40  ;;  %v3260_v47 = vand.u32 4294901760, %v78_v14 }
  0x79   :  { %892 = vmatpush.msrb.mxu1 %v891_v26  ;;  %1029 = vmatpush.msrb.mxu3 %v3041_v20  ;;  %v921_v26 = vand.u32 4294901760, %v920_v42  ;;  %v3258_v42 = vsub.f32 %v49_v27, %v3224_v52  ;;  %v944_v27 = vsub.f32 %v3210_v25, %v4278_v31 }
  0x7a   :  { %841 = vmatpush.msrb.mxu0 %v3113_v19  ;;  %987 = vmatpush.msrb.mxu2 %v3116_v33  ;;  %v3288_v31 = vsub.f32 %v78_v14, %v3260_v47 }
  0x7b   :  { %898 = vmatpush.msrb.mxu1 %v897_v24  ;;  %1031 = vmatpush.msrb.mxu3 %v3067_v5  ;;  %v3240_v24 = vand.u32 4294901760, %v79_v38  ;;  %v945_v14 = vand.u32 4294901760, %v944_v27 }
  0x7c   :  { %843 = vmatpush.msrb.mxu0 %v3128_v41  ;;  %990 = vmatpush.msrb.mxu2 %v3132_v11  ;;  %v4286_v27 = vand.u32 4294901760, %v3288_v31 }
  0x7d   :  { %904 = vmatpush.msrb.mxu1 %v903_v35  ;;  %1033 = vmatpush.msrb.mxu3 %v3083_v4  ;;  %v3251_v35 = vsub.f32 %v80_v37, %v3215_v10  ;;  %v4281_v37 = vand.u32 4294901760, %v3230_v54 }
  0x7e   :  { %845 = vmatpush.msrb.mxu0 %v3143_v50  ;;  %993 = vmatpush.msrb.mxu2 %v3147_v0 }
  0x7f   :  { %910 = vmatpush.msrb.mxu1 %v909_v17  ;;  %1035 = vmatpush.msrb.mxu3 %v3097_v46  ;;  %v938_v17 = vsub.f32 %v3192_v36, %v4274_v44  ;;  %v3275_v44 = vsub.f32 %v79_v38, %v3240_v24  ;;  %v4283_v58 = vand.u32 4294901760, %v3251_v35  ;;  %v4284_v38 = vand.u32 4294901760, %v3258_v42 }
  0x80   :  { %847 = vmatpush.msrb.mxu0 %v3160_v39  ;;  %996 = vmatpush.msrb.mxu2 %v3164_v12  ;;  %v950_v63 = vsub.f32 %v3230_v54, %v4281_v37  ;;  %v3310_v37 = vsub.f32 %v76_v18, %v3280_v53 }
  0x81   :  { %916 = vmatpush.msrb.mxu1 %v915_v8  ;;  %1037 = vmatpush.msrb.mxu3 %v3113_v19  ;;  %v3268_v8 = vand.u32 4294901760, %v77_v30  ;;  %v939_v43 = vand.u32 4294901760, %v938_v17  ;;  %v4287_v17 = vand.u32 4294901760, %v3275_v44 }
  0x82   :  { %849 = vmatpush.msrb.mxu0 %v3172_v32  ;;  %999 = vmatpush.msrb.mxu2 %v3176_v57  ;;  %v951_v18 = vand.u32 4294901760, %v950_v63  ;;  %v4289_v48 = vand.u32 4294901760, %v3310_v37 }
  0x83   :  { %922 = vmatpush.msrb.mxu1 %v921_v26  ;;  %1039 = vmatpush.msrb.mxu3 %v3128_v41  ;;  %v75_v26 = vld [vmem:[%s4245_s1 + $0x1d0] sm:$0xff]  ;;  %v3296_v34 = vsub.f32 %v77_v30, %v3268_v8  ;;  %v1207_v30 = vsub.f32 %v3251_v35, %v4283_v58 }
  0x84   :  { %851 = vmatpush.msrb.mxu0 %v3199_v60  ;;  %1002 = vmatpush.msrb.mxu2 %v3192_v36  ;;  %v3303_v2 = vand.u32 4294901760, %v75_v26 }
  0x85   :  { %928 = vmatpush.msrb.mxu1 %v927_v45  ;;  %1041 = vmatpush.msrb.mxu3 %v3143_v50  ;;  %v74_v45 = vld [vmem:[%s4245_s1 + $0x1c8] sm:$0xff]  ;;  %v4288_v58 = vand.u32 4294901760, %v3296_v34  ;;  %v1208_v63 = vand.u32 4294901760, %v1207_v30  ;;  %v3354_v30 = vand.u32 4294901760, %v72_v22 }
  0x86   :  { %853 = vmatpush.msrb.mxu0 %v3224_v52  ;;  %1005 = vmatpush.msrb.mxu2 %v3210_v25  ;;  %v3321_v59 = vand.u32 4294901760, %v74_v45 }
  0x87   :  { %934 = vmatpush.msrb.mxu1 %v933_v9  ;;  %1043 = vmatpush.msrb.mxu3 %v3160_v39  ;;  %v73_v9 = vld [vmem:[%s4245_s1 + $0x1c0] sm:$0xff]  ;;  %v1225_v6 = vsub.f32 %v3296_v34, %v4288_v58  ;;  %v1231_v58 = vsub.f32 %v3310_v37, %v4289_v48 }
  0x88   :  { %859 = vmatmul.f32.vlgmr.msrb.gmra.mxu0 %v858_v51  ;;  %1008 = vmatpush.msrb.mxu2 %v3230_v54  ;;  %v956_v51 = vsub.f32 %v3258_v42, %v4284_v38  ;;  %v3337_v38 = vand.u32 4294901760, %v73_v9 }
  0x89   :  { %1060 = vmatpush.msra.mxu0 %v865_v16  ;;  %940 = vmatpush.msrb.mxu1 %v939_v43  ;;  %v1213_v16 = vsub.f32 %v3275_v44, %v4287_v17  ;;  %v3335_v43 = vsub.f32 %v75_v26, %v3303_v2  ;;  %v1219_v26 = vsub.f32 %v3288_v31, %v4286_v27  ;;  %v3371_v17 = vand.u32 4294901760, %v71_v61 }
  0x8a   :  { %1045 = vmatpush.msrb.mxu3 %v3172_v32  ;;  %1011 = vmatpush.msrb.mxu2 %v3258_v42  ;;  %v1232_v48 = vand.u32 4294901760, %v1231_v58  ;;  %v4351_v58 = vand.u32 4294901760, %v3100_v40  ;;  %v66_v40 = vld [vmem:[%s4245_s1 + $0x188] sm:$0xff] }
  0x8b   :  { %1064 = vmatpush.msra.mxu0 %v871_v21  ;;  %946 = vmatpush.msrb.mxu1 %v945_v14  ;;  %v957_v21 = vand.u32 4294901760, %v956_v51  ;;  %v3352_v14 = vsub.f32 %v74_v45, %v3321_v59  ;;  %v4348_v51 = vand.u32 4294901760, %v3051_v29  ;;  %v1214_v45 = vand.u32 4294901760, %v1213_v16  ;;  %v69_v29 = vld [vmem:[%s4245_s1 + $0x1a0] sm:$0xff] }
  0x8c   :  { %1047 = vmatpush.msrb.mxu3 %v3199_v60  ;;  %1014 = vmatmul.f32.vlgmr.msrb.gmra.mxu2 %v3184_v7  ;;  %v4290_v27 = vand.u32 4294901760, %v3335_v43  ;;  %v4349_v7 = vand.u32 4294901760, %v3056_v55  ;;  %v3384_v16 = vsub.f32 %v72_v22, %v3354_v30 }
  0x8d   :  { %1068 = vmatpush.msra.mxu0 %v877_v3  ;;  %1164 = vmatpush.msra.mxu2 %v3215_v10  ;;  %v70_v3 = vld [vmem:[%s4245_s1 + $0x1a8] sm:$0xff] }
  0x8e   :  { %952 = vmatpush.msrb.mxu1 %v951_v18  ;;  %1049 = vmatpush.msrb.mxu3 %v3224_v52  ;;  %v3369_v18 = vsub.f32 %v73_v9, %v3337_v38  ;;  %v4291_v9 = vand.u32 4294901760, %v3352_v14  ;;  %v1237_v55 = vsub.f32 %v3335_v43, %v4290_v27 }
  0x8f   :  { %1053 = vmatmul.f32.vlgmr.msrb.gmra.mxu3 %v856_v1  ;;  %1072 = vmatpush.msra.mxu0 %v4348_v51  ;;  %v1220_v1 = vand.u32 4294901760, %v1219_v26  ;;  %v3386_v51 = vand.u32 4294901760, %v70_v3  ;;  %v3399_v26 = vsub.f32 %v71_v61, %v3371_v17 }
  0x90   :  { %1166 = vmatpush.msra.mxu2 %v3240_v24  ;;  %1209 = vmatpush.msra.mxu3 %v1208_v63  ;;  %v1226_v63 = vand.u32 4294901760, %v1225_v6  ;;  %v4292_v22 = vand.u32 4294901760, %v3369_v18  ;;  %v4350_v6 = vand.u32 4294901760, %v3073_v62  ;;  %v67_v62 = vld [vmem:[%s4245_s1 + $0x190] sm:$0xff] }
  0x91   :  { %958 = vmatpush.msrb.mxu1 %v957_v21  ;;  %1076 = vmatpush.msra.mxu0 %v4349_v7  ;;  %v68_v21 = vld [vmem:[%s4245_s1 + $0x198] sm:$0xff]  ;;  %v3401_v7 = vand.u32 4294901760, %v69_v29  ;;  %v3412_v61 = vsub.f32 %v70_v3, %v3386_v51 }
  0x92   :  { %960 = vmatmul.f32.vlgmr.msrb.gmra.mxu1 %v3154_v56  ;;  %1168 = vmatpush.msra.mxu2 %v3260_v47  ;;  %v3414_v27 = vand.u32 4294901760, %v68_v21  ;;  %v1249_v3 = vsub.f32 %v3369_v18, %v4292_v22 }
  0x93   :  { %1127 = vmatpush.msra.mxu1 %v2987_v28  ;;  %1215 = vmatpush.msra.mxu3 %v1214_v45  ;;  %v1243_v28 = vsub.f32 %v3352_v14, %v4291_v9  ;;  %v4293_v45 = vand.u32 4294901760, %v3384_v16  ;;  %v4352_v9 = vand.u32 4294901760, %v3116_v33  ;;  %v65_v33 = vld [vmem:[%s4245_s1 + $0x180] sm:$0xff] }
  0x94   :  { %1080 = vmatpush.msra.mxu0 %v4350_v6  ;;  %1170 = vmatpush.msra.mxu2 %v3268_v8  ;;  %v3428_v6 = vsub.f32 %v69_v29, %v3401_v7  ;;  %v3444_v22 = vsub.f32 %v68_v21, %v3414_v27 }
  0x95   :  { %1129 = vmatpush.msra.mxu1 %v2997_v13  ;;  %1221 = vmatpush.msra.mxu3 %v1220_v1  ;;  %v1238_v13 = vand.u32 4294901760, %v1237_v55  ;;  %v4294_v1 = vand.u32 4294901760, %v3399_v26  ;;  %v1255_v29 = vsub.f32 %v3384_v16, %v4293_v45  ;;  %v4354_v55 = vand.u32 4294901760, %v3147_v0 }
  0x96   :  { %1084 = vmatpush.msra.mxu0 %v4351_v58  ;;  %1172 = vmatpush.msra.mxu2 %v3280_v53  ;;  %v127_v58 = vld.sshfl [vmem:[#allocation1 + $0x18] sm:$0xff pattern:$0x73625140]  ;;  %v1272_v45 = vand.u32 4294901760, %v3428_v6  ;;  %v4356_v0 = vand.u32 4294901760, %v3164_v12 }
  0x97   :  { %1131 = vmatpush.msra.mxu1 %v3007_v23  ;;  %1227 = vmatpush.msra.mxu3 %v1226_v63  ;;  %v3436_v23 = vand.u32 4294901760, %v67_v62  ;;  %v1244_v63 = vand.u32 4294901760, %v1243_v28  ;;  %v1250_v28 = vand.u32 4294901760, %v1249_v3  ;;  %v1261_v21 = vsub.f32 %v3399_v26, %v4294_v1 }
  0x98   :  { %1088 = vmatpush.msra.mxu0 %v4352_v9  ;;  %1174 = vmatpush.msra.mxu2 %v3303_v2  ;;  %v4353_v9 = vand.u32 4294901760, %v3132_v11  ;;  %v1278_v1 = vand.u32 4294901760, %v3444_v22 }
  0x99   :  { %1133 = vmatpush.msra.mxu1 %v3020_v15  ;;  %1233 = vmatpush.msra.mxu3 %v1232_v48  ;;  %v3452_v15 = vand.u32 4294901760, %v66_v40  ;;  %v3454_v48 = vand.u32 4294901760, %v127_v58  ;;  %v3465_v11 = vsub.f32 %v67_v62, %v3436_v23 }
  0x9a   :  { %1092 = vmatpush.msra.mxu0 %v4353_v9  ;;  %1176 = vmatpush.msra.mxu2 %v3321_v59  ;;  %v3467_v9 = vand.u32 4294901760, %v65_v33 }
  0x9b   :  { %1135 = vmatpush.msra.mxu1 %v3030_v49  ;;  %1239 = vmatpush.msra.mxu3 %v1238_v13  ;;  %v1256_v49 = vand.u32 4294901760, %v1255_v29  ;;  %v4355_v13 = vand.u32 4294901760, %v3412_v61  ;;  %v3478_v62 = vsub.f32 %v66_v40, %v3452_v15  ;;  %v4357_v29 = vand.u32 4294901760, %v3176_v57 }
  0x9c   :  { %1096 = vmatpush.msra.mxu0 %v4354_v55  ;;  %1178 = vmatpush.msra.mxu2 %v3337_v38  ;;  %v3481_v55 = vsub.f32 %v127_v58, %v3454_v48  ;;  %v1284_v12 = vand.u32 4294901760, %v3465_v11  ;;  %v3492_v40 = vsub.f32 %v65_v33, %v3467_v9  ;;  %v1279_v58 = vsub.f32 %v3444_v22, %v1278_v1 }
  0x9d   :  { %1137 = vmatpush.msra.mxu1 %v3041_v20  ;;  %1245 = vmatpush.msra.mxu3 %v1244_v63  ;;  %v1267_v3 = vsub.f32 %v3412_v61, %v4355_v13  ;;  %v1262_v20 = vand.u32 4294901760, %v1261_v21  ;;  %v1273_v63 = vsub.f32 %v3428_v6, %v1272_v45  ;;  %v1290_v57 = vand.u32 4294901760, %v3478_v62 }
  0x9e   :  { %1100 = vmatpush.msra.mxu0 %v4356_v0  ;;  %1180 = vmatpush.msra.mxu2 %v3354_v30  ;;  %v1197_v21 = vand.u32 4294901760, %v3481_v55  ;;  %v1280_v13 = vand.u32 4294901760, %v1279_v58  ;;  %v87_v58 = vld [vmem:[%s4245_s1 + $0x230] sm:$0xff] }
  0x9f   :  { %1139 = vmatpush.msra.mxu1 %v3067_v5  ;;  %1251 = vmatpush.msra.mxu3 %v1250_v28  ;;  %v1268_v5 = vand.u32 4294901760, %v1267_v3  ;;  %v4358_v28 = vand.u32 4294901760, %v3192_v36  ;;  %v1274_v33 = vand.u32 4294901760, %v1273_v63  ;;  %v1285_v36 = vsub.f32 %v3465_v11, %v1284_v12 }
  0xa0   :  { %1104 = vmatpush.msra.mxu0 %v4357_v29  ;;  %1182 = vmatpush.msra.mxu2 %v3371_v17  ;;  %v4360_v3 = vand.u32 4294901760, %v3230_v54  ;;  %v88_v29 = vld [vmem:[%s4245_s1 + $0x238] sm:$0xff] }
  0xa1   :  { %1141 = vmatpush.msra.mxu1 %v3083_v4  ;;  %1257 = vmatpush.msra.mxu3 %v1256_v49  ;;  %v4359_v4 = vand.u32 4294901760, %v3210_v25  ;;  %v1296_v49 = vand.u32 4294901760, %v3492_v40  ;;  %v1198_v25 = vsub.f32 %v3481_v55, %v1197_v21  ;;  %v1286_v54 = vand.u32 4294901760, %v1285_v36 }
  0xa2   :  { %1108 = vmatpush.msra.mxu0 %v4358_v28  ;;  %1184 = vmatpush.msra.mxu2 %v3386_v51 }
  0xa3   :  { %1143 = vmatpush.msra.mxu1 %v3097_v46  ;;  %1263 = vmatpush.msra.mxu3 %v1262_v20  ;;  %v1291_v46 = vsub.f32 %v3478_v62, %v1290_v57  ;;  %v1297_v0 = vsub.f32 %v3492_v40, %v1296_v49 }
  0xa4   :  { %1112 = vmatpush.msra.mxu0 %v4359_v4  ;;  %1186 = vmatpush.msra.mxu2 %v3401_v7 }
  0xa5   :  { %1145 = vmatpush.msra.mxu1 %v3113_v19  ;;  %1269 = vmatpush.msra.mxu3 %v1268_v5  ;;  %v4361_v19 = vand.u32 4294901760, %v3258_v42  ;;  %v1292_v20 = vand.u32 4294901760, %v1291_v46  ;;  %v1298_v42 = vand.u32 4294901760, %v1297_v0  ;;  %v85_v46 = vld [vmem:[%s4245_s1 + $0x220] sm:$0xff] }
  0xa6   :  { %1116 = vmatpush.msra.mxu0 %v4360_v3  ;;  %1188 = vmatpush.msra.mxu2 %v3414_v27 }
  0xa7   :  { %1147 = vmatpush.msra.mxu1 %v3128_v41  ;;  %1275 = vmatpush.msra.mxu3 %v1274_v33  ;;  %v1199_v41 = vand.u32 4294901760, %v1198_v25  ;;  %v3706_v33 = vand.u32 4294901760, %v88_v29 }
  0xa8   :  { %1120 = vmatpush.msra.mxu0 %v4361_v19  ;;  %1190 = vmatpush.msra.mxu2 %v3436_v23 }
  0xa9   :  { %1149 = vmatpush.msra.mxu1 %v3143_v50  ;;  %1281 = vmatpush.msra.mxu3 %v1280_v13  ;;  %v4362_v50 = vand.u32 4294901760, %v3251_v35  ;;  %v3722_v13 = vand.u32 4294901760, %v87_v58 }
  0xaa   :  { %1122 = vmatmul.f32.vlgmr.msra.gmra.mxu0 %v3154_v56  ;;  %1192 = vmatpush.msra.mxu2 %v3452_v15 }
  0xab   :  { %1307 = vmatpush.msrb.mxu0 %v3251_v35  ;;  %1151 = vmatpush.msra.mxu1 %v3160_v39  ;;  %v4363_v39 = vand.u32 4294901760, %v3275_v44  ;;  %v94_v35 = vld [vmem:[%s4245_s1 + $0x268] sm:$0xff] }
  0xac   :  { %1287 = vmatpush.msra.mxu3 %v1286_v54  ;;  %1194 = vmatpush.msra.mxu2 %v3467_v9 }
  0xad   :  { %1310 = vmatpush.msrb.mxu0 %v3275_v44  ;;  %1153 = vmatpush.msra.mxu1 %v3172_v32  ;;  %v4364_v32 = vand.u32 4294901760, %v3288_v31  ;;  %v4370_v44 = vand.u32 4294901760, %v3384_v16 }
  0xae   :  { %1293 = vmatpush.msra.mxu3 %v1292_v20  ;;  %1200 = vmatmul.f32.vlgmr.msra.gmra.mxu2 %v1199_v41  ;;  %v84_v20 = vld [vmem:[%s4245_s1 + $0x218] sm:$0xff] }
  0xaf   :  { %1313 = vmatpush.msrb.mxu0 %v3288_v31  ;;  %1401 = vmatpush.msrb.mxu2 %v4362_v50  ;;  %v4371_v31 = vand.u32 4294901760, %v3399_v26 }
  0xb0   :  { %1155 = vmatpush.msra.mxu1 %v3199_v60  ;;  %1299 = vmatpush.msra.mxu3 %v1298_v42  ;;  %v4365_v60 = vand.u32 4294901760, %v3296_v34  ;;  %v3752_v42 = vand.u32 4294901760, %v85_v46 }
  0xb1   :  { %1301 = vmatmul.f32.vlgmr.msra.gmra.mxu3 %v3454_v48  ;;  %1316 = vmatpush.msrb.mxu0 %v3296_v34  ;;  %v16_v34 = vld [vmem:[%s4244_s0 + $0x8] sm:$0x3f] }
  0xb2   :  { %1405 = vmatpush.msrb.mxu2 %v4363_v39  ;;  %1468 = vmatpush.msrb.mxu3 %v3215_v10  ;;  %123 = vst [vmem:[#allocation1 + $0x20] ss:$4 sm:$0xff] %v16_v34  ;;  %v3756_v39 = vsub.f32 %v87_v58, %v3722_v13  ;;  %v3769_v34 = vand.u32 4294901760, %v84_v20 }
  0xb3   :  { %1157 = vmatpush.msra.mxu1 %v3224_v52  ;;  %1319 = vmatpush.msrb.mxu0 %v3310_v37  ;;  %v4368_v52 = vand.u32 4294901760, %v3352_v14 }
  0xb4   :  { %1159 = vmatmul.f32.vlgmr.msra.gmra.mxu1 %v3154_v56  ;;  %1409 = vmatpush.msrb.mxu2 %v4364_v32  ;;  %v4366_v56 = vand.u32 4294901760, %v3310_v37 }
  0xb5   :  { %1360 = vmatpush.msrb.mxu1 %v3215_v10  ;;  %1470 = vmatpush.msrb.mxu3 %v3240_v24  ;;  %v4367_v10 = vand.u32 4294901760, %v3335_v43 }
  0xb6   :  { %1322 = vmatpush.msrb.mxu0 %v3335_v43  ;;  %1413 = vmatpush.msrb.mxu2 %v4365_v60  ;;  %v83_v60 = vld [vmem:[%s4245_s1 + $0x210] sm:$0xff] }
  0xb7   :  { %1362 = vmatpush.msrb.mxu1 %v3240_v24  ;;  %1472 = vmatpush.msrb.mxu3 %v3260_v47 }
  0xb8   :  { %1325 = vmatpush.msrb.mxu0 %v3352_v14  ;;  %1417 = vmatpush.msrb.mxu2 %v4366_v56  ;;  %v92_v14 = vld [vmem:[%s4245_s1 + $0x258] sm:$0xff] }
  0xb9   :  { %1364 = vmatpush.msrb.mxu1 %v3260_v47  ;;  %1474 = vmatpush.msrb.mxu3 %v3268_v8  ;;  %v4369_v47 = vand.u32 4294901760, %v3369_v18 }
  0xba   :  { %1328 = vmatpush.msrb.mxu0 %v3369_v18  ;;  %1421 = vmatpush.msrb.mxu2 %v4367_v10  ;;  %v91_v18 = vld [vmem:[%s4245_s1 + $0x250] sm:$0xff] }
  0xbb   :  { %1366 = vmatpush.msrb.mxu1 %v3268_v8  ;;  %1476 = vmatpush.msrb.mxu3 %v3280_v53  ;;  %v93_v8 = vld [vmem:[%s4245_s1 + $0x260] sm:$0xff] }
  0xbc   :  { %1331 = vmatpush.msrb.mxu0 %v3384_v16  ;;  %1425 = vmatpush.msrb.mxu2 %v4368_v52  ;;  %v3640_v16 = vand.u32 4294901760, %v92_v14 }
  0xbd   :  { %1368 = vmatpush.msrb.mxu1 %v3280_v53  ;;  %1478 = vmatpush.msrb.mxu3 %v3303_v2  ;;  %v96_v53 = vld [vmem:[%s4245_s1 + $0x278] sm:$0xff] }
  0xbe   :  { %1334 = vmatpush.msrb.mxu0 %v3399_v26  ;;  %1429 = vmatpush.msrb.mxu2 %v4369_v47  ;;  %v3596_v24 = vand.u32 4294901760, %v96_v53  ;;  %v3651_v26 = vand.u32 4294901760, %v91_v18 }
  0xbf   :  { %1370 = vmatpush.msrb.mxu1 %v3303_v2  ;;  %1480 = vmatpush.msrb.mxu3 %v3321_v59  ;;  %v95_v2 = vld [vmem:[%s4245_s1 + $0x270] sm:$0xff] }
  0xc0   :  { %1337 = vmatpush.msrb.mxu0 %v3412_v61  ;;  %1433 = vmatpush.msrb.mxu2 %v4370_v44  ;;  %v3606_v37 = vand.u32 4294901760, %v95_v2  ;;  %v3619_v43 = vsub.f32 %v96_v53, %v3596_v24  ;;  %v3682_v63 = vsub.f32 %v91_v18, %v3651_v26 }
  0xc1   :  { %1372 = vmatpush.msrb.mxu1 %v3321_v59  ;;  %1482 = vmatpush.msrb.mxu3 %v3337_v38  ;;  %v4372_v59 = vand.u32 4294901760, %v3412_v61 }
  0xc2   :  { %1340 = vmatpush.msrb.mxu0 %v3428_v6  ;;  %1437 = vmatpush.msrb.mxu2 %v4371_v31  ;;  %v89_v6 = vld [vmem:[%s4245_s1 + $0x240] sm:$0xff]  ;;  %v4303_v4 = vand.u32 4294901760, %v3682_v63  ;;  %v3781_v31 = vand.u32 4294901760, %v83_v60 }
  0xc3   :  { %1374 = vmatpush.msrb.mxu1 %v3337_v38  ;;  %1484 = vmatpush.msrb.mxu3 %v3354_v30  ;;  %v3616_v38 = vand.u32 4294901760, %v94_v35 }
  0xc4   :  { %1343 = vmatpush.msrb.mxu0 %v3444_v22  ;;  %1441 = vmatpush.msrb.mxu2 %v4372_v59  ;;  %v1578_v0 = vsub.f32 %v3682_v63, %v4303_v4  ;;  %v3785_v59 = vsub.f32 %v85_v46, %v3752_v42 }
  0xc5   :  { %1376 = vmatpush.msrb.mxu1 %v3354_v30  ;;  %1486 = vmatpush.msrb.mxu3 %v3371_v17  ;;  %v3632_v30 = vsub.f32 %v95_v2, %v3606_v37  ;;  %v3646_v22 = vsub.f32 %v94_v35, %v3616_v38  ;;  %v4298_v2 = vand.u32 4294901760, %v3756_v39  ;;  %v82_v35 = vld [vmem:[%s4245_s1 + $0x208] sm:$0xff] }
  0xc6   :  { %1346 = vmatpush.msrb.mxu0 %v3465_v11  ;;  %1445 = vmatpush.msrb.mxu2 %v1272_v45  ;;  %v90_v45 = vld [vmem:[%s4245_s1 + $0x248] sm:$0xff]  ;;  %v1579_v44 = vand.u32 4294901760, %v1578_v0 }
  0xc7   :  { %1378 = vmatpush.msrb.mxu1 %v3371_v17  ;;  %1488 = vmatpush.msrb.mxu3 %v3386_v51  ;;  %v3629_v17 = vand.u32 4294901760, %v93_v8  ;;  %v3676_v11 = vand.u32 4294901760, %v90_v45 }
  0xc8   :  { %1349 = vmatpush.msrb.mxu0 %v3478_v62  ;;  %1449 = vmatpush.msrb.mxu2 %v1278_v1  ;;  %v3666_v1 = vsub.f32 %v92_v14, %v3640_v16  ;;  %v1559_v62 = vand.u32 4294901760, %v3646_v22 }
  0xc9   :  { %1380 = vmatpush.msrb.mxu1 %v3386_v51  ;;  %1490 = vmatpush.msrb.mxu3 %v3401_v7  ;;  %v1547_v51 = vand.u32 4294901760, %v3619_v43  ;;  %v3660_v61 = vsub.f32 %v93_v8, %v3629_v17 }
  0xca   :  { %1352 = vmatpush.msrb.mxu0 %v3492_v40  ;;  %1453 = vmatpush.msrb.mxu2 %v1284_v12  ;;  %v3692_v12 = vand.u32 4294901760, %v89_v6  ;;  %v4305_v5 = vand.u32 4294901760, %v3666_v1 }
  0xcb   :  { %1382 = vmatpush.msrb.mxu1 %v3401_v7  ;;  %1492 = vmatpush.msrb.mxu3 %v3414_v27  ;;  %v1553_v7 = vand.u32 4294901760, %v3632_v30  ;;  %v4308_v40 = vand.u32 4294901760, %v3660_v61 }
  0xcc   :  { %1355 = vmatmul.f32.vlgmr.msrb.gmra.mxu0 %v3481_v55  ;;  %1457 = vmatpush.msrb.mxu2 %v1290_v57  ;;  %v1560_v57 = vsub.f32 %v3646_v22, %v1559_v62  ;;  %v3725_v3 = vsub.f32 %v89_v6, %v3692_v12  ;;  %v3741_v55 = vsub.f32 %v88_v29, %v3706_v33  ;;  %v3808_v29 = vand.u32 4294901760, %v82_v35 }
  0xcd   :  { %1505 = vmatpush.msra.mxu0 %v3596_v24  ;;  %1384 = vmatpush.msrb.mxu1 %v3414_v27  ;;  %v1548_v27 = vsub.f32 %v3619_v43, %v1547_v51  ;;  %v3801_v6 = vsub.f32 %v84_v20, %v3769_v34 }
  0xce   :  { %1494 = vmatpush.msrb.mxu3 %v3436_v23  ;;  %1461 = vmatpush.msrb.mxu2 %v1296_v49  ;;  %v1566_v49 = vsub.f32 %v3660_v61, %v4308_v40  ;;  %v1561_v25 = vand.u32 4294901760, %v1560_v57  ;;  %v4300_v50 = vand.u32 4294901760, %v3725_v3  ;;  %v4299_v52 = vand.u32 4294901760, %v3741_v55 }
  0xcf   :  { %1507 = vmatpush.msra.mxu0 %v3606_v37  ;;  %1386 = vmatpush.msrb.mxu1 %v3436_v23  ;;  %v1554_v23 = vsub.f32 %v3632_v30, %v1553_v7  ;;  %v1549_v28 = vand.u32 4294901760, %v1548_v27  ;;  %v112_v27 = vld [vmem:[%s4245_s1 + $0x2f8] sm:$0xff]  ;;  %v4295_v57 = vand.u32 4294901760, %v3785_v59  ;;  %v4297_v0 = vand.u32 4294901760, %v3801_v6 }
  0xd0   :  { %1496 = vmatpush.msrb.mxu3 %v3452_v15  ;;  %1463 = vmatmul.f32.vlgmr.msrb.gmra.mxu2 %v3454_v48  ;;  %v1567_v41 = vand.u32 4294901760, %v1566_v49  ;;  %v1590_v53 = vsub.f32 %v3725_v3, %v4300_v50  ;;  %v1596_v18 = vsub.f32 %v3741_v55, %v4299_v52  ;;  %v3824_v49 = vand.u32 4294901760, %v112_v27 }
  0xd1   :  { %1509 = vmatpush.msra.mxu0 %v3616_v38  ;;  %1648 = vmatpush.msra.mxu2 %v3619_v43  ;;  %v1555_v36 = vand.u32 4294901760, %v1554_v23  ;;  %v81_v23 = vld [vmem:[%s4245_s1 + $0x200] sm:$0xff]  ;;  %v3839_v20 = vsub.f32 %v82_v35, %v3808_v29  ;;  %v104_v43 = vld [vmem:[%s4245_s1 + $0x2b8] sm:$0xff] }
  0xd2   :  { %1388 = vmatpush.msrb.mxu1 %v3452_v15  ;;  %1498 = vmatpush.msrb.mxu3 %v3467_v9  ;;  %v3709_v15 = vsub.f32 %v90_v45, %v3676_v11  ;;  %v1591_v58 = vand.u32 4294901760, %v1590_v53  ;;  %v1597_v46 = vand.u32 4294901760, %v1596_v18  ;;  %v109_v53 = vld [vmem:[%s4245_s1 + $0x2e0] sm:$0xff] }
  0xd3   :  { %1500 = vmatmul.f32.vlgmr.msrb.gmra.mxu3 %v3454_v48  ;;  %1511 = vmatpush.msra.mxu0 %v3629_v17  ;;  %v86_v48 = vld [vmem:[%s4245_s1 + $0x228] sm:$0xff] }
  0xd4   :  { %1651 = vmatpush.msra.mxu2 %v3632_v30  ;;  %1701 = vmatpush.msra.mxu3 %v3596_v24  ;;  %v3737_v19 = vand.u32 4294901760, %v86_v48  ;;  %v4302_v54 = vand.u32 4294901760, %v3709_v15  ;;  %v103_v30 = vld [vmem:[%s4245_s1 + $0x2b0] sm:$0xff] }
  0xd5   :  { %1390 = vmatpush.msrb.mxu1 %v3467_v9  ;;  %1513 = vmatpush.msra.mxu0 %v3640_v16  ;;  %v1572_v9 = vsub.f32 %v3666_v1, %v4305_v5 }
  0xd6   :  { %1394 = vmatmul.f32.vlgmr.msrb.gmra.mxu1 %v1197_v21  ;;  %1654 = vmatpush.msra.mxu2 %v3646_v22  ;;  %v128_v21 = vld.sshfl [vmem:[#allocation1 + $0x20] sm:$0xff pattern:$0x73625140]  ;;  %v1584_v10 = vsub.f32 %v3709_v15, %v4302_v54  ;;  %v3773_v47 = vsub.f32 %v86_v48, %v3737_v19  ;;  %v3819_v48 = vsub.f32 %v83_v60, %v3781_v31 }
  0xd7   :  { %1550 = vmatpush.msra.mxu1 %v1549_v28  ;;  %1703 = vmatpush.msra.mxu3 %v3606_v37  ;;  %v1573_v32 = vand.u32 4294901760, %v1572_v9  ;;  %v3763_v56 = vand.u32 4294901760, %v128_v21  ;;  %v1602_v28 = vsub.f32 %v3756_v39, %v4298_v2  ;;  %v111_v9 = vld [vmem:[%s4245_s1 + $0x2f0] sm:$0xff]  ;;  %v1614_v60 = vsub.f32 %v3785_v59, %v4295_v57 }
  0xd8   :  { %1515 = vmatpush.msra.mxu0 %v3651_v26  ;;  %1657 = vmatpush.msra.mxu2 %v3660_v61  ;;  %v1585_v14 = vand.u32 4294901760, %v1584_v10  ;;  %v4296_v45 = vand.u32 4294901760, %v3773_v47  ;;  %v4301_v10 = vand.u32 4294901760, %v3819_v48 }
  0xd9   :  { %1556 = vmatpush.msra.mxu1 %v1555_v36  ;;  %1705 = vmatpush.msra.mxu3 %v3616_v38  ;;  %v3793_v8 = vsub.f32 %v128_v21, %v3763_v56  ;;  %v3833_v21 = vand.u32 4294901760, %v81_v23 }
  0xda   :  { %1517 = vmatpush.msra.mxu0 %v3676_v11  ;;  %1660 = vmatpush.msra.mxu2 %v3666_v1 }
  0xdb   :  { %1562 = vmatpush.msra.mxu1 %v1561_v25  ;;  %1707 = vmatpush.msra.mxu3 %v3629_v17  ;;  %v1538_v36 = vand.u32 4294901760, %v3793_v8  ;;  %v1608_v25 = vsub.f32 %v3773_v47, %v4296_v45  ;;  %v108_v45 = vld [vmem:[%s4245_s1 + $0x2d8] sm:$0xff] }
  0xdc   :  { %1519 = vmatpush.msra.mxu0 %v3692_v12  ;;  %1663 = vmatpush.msra.mxu2 %v3682_v63  ;;  %v3889_v50 = vand.u32 4294901760, %v108_v45 }
  0xdd   :  { %1568 = vmatpush.msra.mxu1 %v1567_v41  ;;  %1709 = vmatpush.msra.mxu3 %v3640_v16  ;;  %v110_v41 = vld [vmem:[%s4245_s1 + $0x2e8] sm:$0xff]  ;;  %v1539_v35 = vsub.f32 %v3793_v8, %v1538_v36  ;;  %v1609_v18 = vand.u32 4294901760, %v1608_v25  ;;  %v1615_v25 = vand.u32 4294901760, %v1614_v60 }
  0xde   :  { %1521 = vmatpush.msra.mxu0 %v3706_v33  ;;  %1666 = vmatpush.msra.mxu2 %v3709_v15  ;;  %v3869_v57 = vand.u32 4294901760, %v110_v41 }
  0xdf   :  { %1574 = vmatpush.msra.mxu1 %v1573_v32  ;;  %1711 = vmatpush.msra.mxu3 %v3651_v26  ;;  %v1603_v32 = vand.u32 4294901760, %v1602_v28  ;;  %v3867_v28 = vsub.f32 %v81_v23, %v3833_v21  ;;  %v1626_v23 = vsub.f32 %v3819_v48, %v4301_v10  ;;  %v1540_v2 = vand.u32 4294901760, %v1539_v35 }
  0xe0   :  { %1523 = vmatpush.msra.mxu0 %v3722_v13  ;;  %1669 = vmatpush.msra.mxu2 %v3725_v3  ;;  %v3897_v10 = vsub.f32 %v110_v41, %v3869_v57 }
  0xe1   :  { %1580 = vmatpush.msra.mxu1 %v1579_v44  ;;  %1713 = vmatpush.msra.mxu3 %v3676_v11  ;;  %v3849_v44 = vand.u32 4294901760, %v111_v9  ;;  %v1627_v41 = vand.u32 4294901760, %v1626_v23 }
  0xe2   :  { %1525 = vmatpush.msra.mxu0 %v3737_v19  ;;  %1672 = vmatpush.msra.mxu2 %v3741_v55  ;;  %v4309_v23 = vand.u32 4294901760, %v3897_v10 }
  0xe3   :  { %1586 = vmatpush.msra.mxu1 %v1585_v14  ;;  %1715 = vmatpush.msra.mxu3 %v3692_v12  ;;  %v3860_v14 = vsub.f32 %v112_v27, %v3824_v49  ;;  %v4304_v27 = vand.u32 4294901760, %v3839_v20 }
  0xe4   :  { %1527 = vmatpush.msra.mxu0 %v3752_v42  ;;  %1675 = vmatpush.msra.mxu2 %v3756_v39 }
  0xe5   :  { %1592 = vmatpush.msra.mxu1 %v1591_v58  ;;  %1717 = vmatpush.msra.mxu3 %v3706_v33  ;;  %v1620_v58 = vsub.f32 %v3801_v6, %v4297_v0  ;;  %v3884_v0 = vsub.f32 %v111_v9, %v3849_v44  ;;  %v4306_v52 = vand.u32 4294901760, %v3860_v14  ;;  %v4307_v9 = vand.u32 4294901760, %v3867_v28 }
  0xe6   :  { %1529 = vmatpush.msra.mxu0 %v3769_v34  ;;  %1678 = vmatpush.msra.mxu2 %v3773_v47  ;;  %v1632_v35 = vsub.f32 %v3839_v20, %v4304_v27  ;;  %v3919_v27 = vsub.f32 %v108_v45, %v3889_v50 }
  0xe7   :  { %1598 = vmatpush.msra.mxu1 %v1597_v46  ;;  %1719 = vmatpush.msra.mxu3 %v3722_v13  ;;  %v3877_v46 = vand.u32 4294901760, %v109_v53  ;;  %v1621_v60 = vand.u32 4294901760, %v1620_v58  ;;  %v4310_v58 = vand.u32 4294901760, %v3884_v0 }
  0xe8   :  { %1531 = vmatpush.msra.mxu0 %v3781_v31  ;;  %1681 = vmatpush.msra.mxu2 %v3785_v59  ;;  %v1633_v45 = vand.u32 4294901760, %v1632_v35  ;;  %v4312_v40 = vand.u32 4294901760, %v3919_v27 }
  0xe9   :  { %1604 = vmatpush.msra.mxu1 %v1603_v32  ;;  %1721 = vmatpush.msra.mxu3 %v3737_v19  ;;  %v107_v32 = vld [vmem:[%s4245_s1 + $0x2d0] sm:$0xff]  ;;  %v3905_v54 = vsub.f32 %v109_v53, %v3877_v46  ;;  %v1889_v53 = vsub.f32 %v3860_v14, %v4306_v52 }
  0xea   :  { %1533 = vmatpush.msra.mxu0 %v3808_v29  ;;  %1684 = vmatpush.msra.mxu2 %v3801_v6  ;;  %v3912_v4 = vand.u32 4294901760, %v107_v32 }
  0xeb   :  { %1610 = vmatpush.msra.mxu1 %v1609_v18  ;;  %1723 = vmatpush.msra.mxu3 %v3752_v42  ;;  %v106_v18 = vld [vmem:[%s4245_s1 + $0x2c8] sm:$0xff]  ;;  %v4311_v52 = vand.u32 4294901760, %v3905_v54  ;;  %v1890_v35 = vand.u32 4294901760, %v1889_v53  ;;  %v3963_v53 = vand.u32 4294901760, %v104_v43 }
  0xec   :  { %1535 = vmatpush.msra.mxu0 %v3833_v21  ;;  %1687 = vmatpush.msra.mxu2 %v3819_v48  ;;  %v3930_v5 = vand.u32 4294901760, %v106_v18 }
  0xed   :  { %1616 = vmatpush.msra.mxu1 %v1615_v25  ;;  %1725 = vmatpush.msra.mxu3 %v3769_v34  ;;  %v105_v25 = vld [vmem:[%s4245_s1 + $0x2c0] sm:$0xff]  ;;  %v1907_v22 = vsub.f32 %v3905_v54, %v4311_v52  ;;  %v1913_v52 = vsub.f32 %v3919_v27, %v4312_v40 }
  0xee   :  { %1541 = vmatmul.f32.vlgmr.msra.gmra.mxu0 %v1540_v2  ;;  %1690 = vmatpush.msra.mxu2 %v3839_v20  ;;  %v1638_v2 = vsub.f32 %v3867_v28, %v4307_v9  ;;  %v3946_v9 = vand.u32 4294901760, %v105_v25 }
  0xef   :  { %1742 = vmatpush.msrb.mxu0 %v1547_v51  ;;  %1622 = vmatpush.msra.mxu1 %v1621_v60  ;;  %v1895_v51 = vsub.f32 %v3884_v0, %v4310_v58  ;;  %v3944_v60 = vsub.f32 %v107_v32, %v3912_v4  ;;  %v1901_v32 = vsub.f32 %v3897_v10, %v4309_v23  ;;  %v3980_v58 = vand.u32 4294901760, %v103_v30 }
  0xf0   :  { %1727 = vmatpush.msra.mxu3 %v3781_v31  ;;  %1693 = vmatpush.msra.mxu2 %v3867_v28  ;;  %v1914_v40 = vand.u32 4294901760, %v1913_v52  ;;  %v4376_v52 = vand.u32 4294901760, %v3709_v15  ;;  %v98_v15 = vld [vmem:[%s4245_s1 + $0x288] sm:$0xff] }
  0xf1   :  { %1746 = vmatpush.msrb.mxu0 %v1553_v7  ;;  %1628 = vmatpush.msra.mxu1 %v1627_v41  ;;  %v1639_v7 = vand.u32 4294901760, %v1638_v2  ;;  %v3961_v41 = vsub.f32 %v106_v18, %v3930_v5  ;;  %v4373_v2 = vand.u32 4294901760, %v3660_v61  ;;  %v1896_v18 = vand.u32 4294901760, %v1895_v51  ;;  %v101_v61 = vld [vmem:[%s4245_s1 + $0x2a0] sm:$0xff] }
  0xf2   :  { %1729 = vmatpush.msra.mxu3 %v3808_v29  ;;  %1696 = vmatmul.f32.vlgmr.msra.gmra.mxu2 %v3793_v8  ;;  %v4313_v23 = vand.u32 4294901760, %v3944_v60  ;;  %v4374_v8 = vand.u32 4294901760, %v3666_v1  ;;  %v3993_v51 = vsub.f32 %v104_v43, %v3963_v53 }
  0xf3   :  { %1750 = vmatpush.msrb.mxu0 %v1559_v62  ;;  %1846 = vmatpush.msrb.mxu2 %v3824_v49  ;;  %v102_v62 = vld [vmem:[%s4245_s1 + $0x2a8] sm:$0xff] }
  0xf4   :  { %1634 = vmatpush.msra.mxu1 %v1633_v45  ;;  %1731 = vmatpush.msra.mxu3 %v3833_v21  ;;  %v3978_v45 = vsub.f32 %v105_v25, %v3946_v9  ;;  %v4314_v25 = vand.u32 4294901760, %v3961_v41  ;;  %v1919_v1 = vsub.f32 %v3944_v60, %v4313_v23 }
  0xf5   :  { %1735 = vmatmul.f32.vlgmr.msra.gmra.mxu3 %v1538_v36  ;;  %1754 = vmatpush.msrb.mxu0 %v4373_v2  ;;  %v1902_v36 = vand.u32 4294901760, %v1901_v32  ;;  %v3995_v2 = vand.u32 4294901760, %v102_v62  ;;  %v4008_v32 = vsub.f32 %v103_v30, %v3980_v58 }
  0xf6   :  { %1848 = vmatpush.msrb.mxu2 %v3849_v44  ;;  %1891 = vmatpush.msrb.mxu3 %v1890_v35  ;;  %v1908_v35 = vand.u32 4294901760, %v1907_v22  ;;  %v4315_v43 = vand.u32 4294901760, %v3978_v45  ;;  %v4375_v22 = vand.u32 4294901760, %v3682_v63  ;;  %v99_v63 = vld [vmem:[%s4245_s1 + $0x290] sm:$0xff] }
  0xf7   :  { %1640 = vmatpush.msra.mxu1 %v1639_v7  ;;  %1758 = vmatpush.msrb.mxu0 %v4374_v8  ;;  %v100_v7 = vld [vmem:[%s4245_s1 + $0x298] sm:$0xff]  ;;  %v4010_v8 = vand.u32 4294901760, %v101_v61  ;;  %v4021_v30 = vsub.f32 %v102_v62, %v3995_v2 }
  0xf8   :  { %1642 = vmatmul.f32.vlgmr.msra.gmra.mxu1 %v3763_v56  ;;  %1850 = vmatpush.msrb.mxu2 %v3869_v57  ;;  %v4023_v23 = vand.u32 4294901760, %v100_v7  ;;  %v1931_v62 = vsub.f32 %v3978_v45, %v4315_v43 }
  0xf9   :  { %1809 = vmatpush.msrb.mxu1 %v3596_v24  ;;  %1897 = vmatpush.msrb.mxu3 %v1896_v18  ;;  %v1925_v24 = vsub.f32 %v3961_v41, %v4314_v25  ;;  %v4316_v18 = vand.u32 4294901760, %v3993_v51  ;;  %v4377_v25 = vand.u32 4294901760, %v3725_v3  ;;  %v97_v3 = vld [vmem:[%s4245_s1 + $0x280] sm:$0xff] }
  0xfa   :  { %1762 = vmatpush.msrb.mxu0 %v4375_v22  ;;  %1852 = vmatpush.msrb.mxu2 %v3877_v46  ;;  %v4037_v22 = vsub.f32 %v101_v61, %v4010_v8  ;;  %v4053_v43 = vsub.f32 %v100_v7, %v4023_v23 }
  0xfb   :  { %1811 = vmatpush.msrb.mxu1 %v3606_v37  ;;  %1903 = vmatpush.msrb.mxu3 %v1902_v36  ;;  %v1920_v37 = vand.u32 4294901760, %v1919_v1  ;;  %v4317_v36 = vand.u32 4294901760, %v4008_v32  ;;  %v1937_v61 = vsub.f32 %v3993_v51, %v4316_v18  ;;  %v4379_v1 = vand.u32 4294901760, %v3756_v39 }
  0xfc   :  { %1766 = vmatpush.msrb.mxu0 %v4376_v52  ;;  %1854 = vmatpush.msrb.mxu2 %v3889_v50  ;;  %v129_v52 = vld.sshfl [vmem:[#allocation1 + $0x28] sm:$0xff pattern:$0x73625140]  ;;  %v1954_v18 = vand.u32 4294901760, %v4037_v22  ;;  %v4381_v39 = vand.u32 4294901760, %v3773_v47 }
  0xfd   :  { %1813 = vmatpush.msrb.mxu1 %v3616_v38  ;;  %1909 = vmatpush.msrb.mxu3 %v1908_v35  ;;  %v4045_v38 = vand.u32 4294901760, %v99_v63  ;;  %v1926_v35 = vand.u32 4294901760, %v1925_v24  ;;  %v1932_v24 = vand.u32 4294901760, %v1931_v62  ;;  %v1943_v7 = vsub.f32 %v4008_v32, %v4317_v36 }
  0xfe   :  { %1770 = vmatpush.msrb.mxu0 %v4377_v25  ;;  %1856 = vmatpush.msrb.mxu2 %v3912_v4  ;;  %v4378_v25 = vand.u32 4294901760, %v3741_v55  ;;  %v1960_v36 = vand.u32 4294901760, %v4053_v43 }
  0xff   :  { %1815 = vmatpush.msrb.mxu1 %v3629_v17  ;;  %1915 = vmatpush.msrb.mxu3 %v1914_v40  ;;  %v4061_v17 = vand.u32 4294901760, %v98_v15  ;;  %v4063_v40 = vand.u32 4294901760, %v129_v52  ;;  %v4074_v55 = vsub.f32 %v99_v63, %v4045_v38 }
 0x100   :  { %1774 = vmatpush.msrb.mxu0 %v4378_v25  ;;  %1858 = vmatpush.msrb.mxu2 %v3930_v5  ;;  %v4076_v25 = vand.u32 4294901760, %v97_v3 }
 0x101   :  { %1817 = vmatpush.msrb.mxu1 %v3640_v16  ;;  %1921 = vmatpush.msrb.mxu3 %v1920_v37  ;;  %v1938_v16 = vand.u32 4294901760, %v1937_v61  ;;  %v4380_v37 = vand.u32 4294901760, %v4021_v30  ;;  %v4087_v63 = vsub.f32 %v98_v15, %v4061_v17  ;;  %v4382_v61 = vand.u32 4294901760, %v3785_v59 }
 0x102   :  { %1778 = vmatpush.msrb.mxu0 %v4379_v1  ;;  %1860 = vmatpush.msrb.mxu2 %v3946_v9  ;;  %v4090_v1 = vsub.f32 %v129_v52, %v4063_v40  ;;  %v1966_v47 = vand.u32 4294901760, %v4074_v55  ;;  %v4101_v15 = vsub.f32 %v97_v3, %v4076_v25  ;;  %v1961_v52 = vsub.f32 %v4053_v43, %v1960_v36 }
 0x103   :  { %1819 = vmatpush.msrb.mxu1 %v3651_v26  ;;  %1927 = vmatpush.msrb.mxu3 %v1926_v35  ;;  %v1949_v62 = vsub.f32 %v4021_v30, %v4380_v37  ;;  %v1944_v26 = vand.u32 4294901760, %v1943_v7  ;;  %v1955_v35 = vsub.f32 %v4037_v22, %v1954_v18  ;;  %v1972_v59 = vand.u32 4294901760, %v4087_v63 }
 0x104   :  { %1782 = vmatpush.msrb.mxu0 %v4381_v39  ;;  %1862 = vmatpush.msrb.mxu2 %v3963_v53  ;;  %v1879_v7 = vand.u32 4294901760, %v4090_v1  ;;  %v1962_v37 = vand.u32 4294901760, %v1961_v52 }
 0x105   :  { %1821 = vmatpush.msrb.mxu1 %v3676_v11  ;;  %1933 = vmatpush.msrb.mxu3 %v1932_v24  ;;  %v1950_v11 = vand.u32 4294901760, %v1949_v62  ;;  %v4383_v24 = vand.u32 4294901760, %v3801_v6  ;;  %v1956_v3 = vand.u32 4294901760, %v1955_v35  ;;  %v1967_v6 = vsub.f32 %v4074_v55, %v1966_v47 }
 0x106   :  { %1786 = vmatpush.msrb.mxu0 %v4382_v61  ;;  %1864 = vmatpush.msrb.mxu2 %v3980_v58  ;;  %v4385_v62 = vand.u32 4294901760, %v3839_v20 }
 0x107   :  { %1823 = vmatpush.msrb.mxu1 %v3692_v12  ;;  %1939 = vmatpush.msrb.mxu3 %v1938_v16  ;;  %v4384_v12 = vand.u32 4294901760, %v3819_v48  ;;  %v1978_v16 = vand.u32 4294901760, %v4101_v15  ;;  %v1880_v48 = vsub.f32 %v4090_v1, %v1879_v7  ;;  %v1968_v20 = vand.u32 4294901760, %v1967_v6 }
 0x108   :  { %1790 = vmatpush.msrb.mxu0 %v4383_v24  ;;  %1866 = vmatpush.msrb.mxu2 %v3995_v2 }
 0x109   :  { %1825 = vmatpush.msrb.mxu1 %v3706_v33  ;;  %1945 = vmatpush.msrb.mxu3 %v1944_v26  ;;  %v1973_v33 = vsub.f32 %v4087_v63, %v1972_v59  ;;  %v1979_v39 = vsub.f32 %v4101_v15, %v1978_v16 }
 0x10a   :  { %1794 = vmatpush.msrb.mxu0 %v4384_v12  ;;  %1868 = vmatpush.msrb.mxu2 %v4010_v8 }
 0x10b   :  { %1827 = vmatpush.msrb.mxu1 %v3722_v13  ;;  %1951 = vmatpush.msrb.mxu3 %v1950_v11  ;;  %v4386_v13 = vand.u32 4294901760, %v3867_v28  ;;  %v1974_v26 = vand.u32 4294901760, %v1973_v33  ;;  %v1980_v28 = vand.u32 4294901760, %v1979_v39 }
 0x10c   :  { %1798 = vmatpush.msrb.mxu0 %v4385_v62  ;;  %1870 = vmatpush.msrb.mxu2 %v4023_v23 }
 0x10d   :  { %1829 = vmatpush.msrb.mxu1 %v3737_v19  ;;  %1957 = vmatpush.msrb.mxu3 %v1956_v3  ;;  %v1881_v19 = vand.u32 4294901760, %v1880_v48 }
 0x10e   :  { %1802 = vmatpush.msrb.mxu0 %v4386_v13  ;;  %1872 = vmatpush.msrb.mxu2 %v4045_v38 }
 0x10f   :  { %1831 = vmatpush.msrb.mxu1 %v3752_v42  ;;  %1963 = vmatpush.msrb.mxu3 %v1962_v37  ;;  %v4387_v42 = vand.u32 4294901760, %v3860_v14 }
 0x110   :  { %1804 = vmatmul.f32.vlgmr.msrb.gmra.mxu0 %v3763_v56  ;;  %1874 = vmatpush.msrb.mxu2 %v4061_v17 }
 0x111   :  { %1989 = vmatpush.msra.mxu0 %v3860_v14  ;;  %1833 = vmatpush.msrb.mxu1 %v3769_v34  ;;  %v4388_v34 = vand.u32 4294901760, %v3884_v0 }
 0x112   :  { %1969 = vmatpush.msrb.mxu3 %v1968_v20  ;;  %1876 = vmatpush.msrb.mxu2 %v4076_v25 }
 0x113   :  { %1992 = vmatpush.msra.mxu0 %v3884_v0  ;;  %1835 = vmatpush.msrb.mxu1 %v3781_v31  ;;  %v4389_v31 = vand.u32 4294901760, %v3897_v10  ;;  %v114_v0 = vld [vmem:[%s4245_s1 + $0x308] sm:$0xff] }
 0x114   :  { %1975 = vmatpush.msrb.mxu3 %v1974_v26  ;;  %1882 = vmatmul.f32.vlgmr.msrb.gmra.mxu2 %v1881_v19  ;;  %v2200_v14 = vand.u32 4294901760, %v114_v0 }
 0x115   :  { %1995 = vmatpush.msra.mxu0 %v3897_v10  ;;  %2083 = vmatpush.msra.mxu2 %v4387_v42 }
 0x116   :  { %1837 = vmatpush.msrb.mxu1 %v3808_v29  ;;  %1981 = vmatpush.msrb.mxu3 %v1980_v28  ;;  %v4390_v29 = vand.u32 4294901760, %v3905_v54 }
 0x117   :  { %1983 = vmatmul.f32.vlgmr.msrb.gmra.mxu3 %v4063_v40  ;;  %1998 = vmatpush.msra.mxu0 %v3905_v54  ;;  %v4393_v54 = vand.u32 4294901760, %v3961_v41 }
 0x118   :  { %2087 = vmatpush.msra.mxu2 %v4388_v34  ;;  %2150 = vmatpush.msra.mxu3 %v3824_v49 }
 0x119   :  { %1839 = vmatpush.msrb.mxu1 %v3833_v21  ;;  %2001 = vmatpush.msra.mxu0 %v3919_v27  ;;  %v130_v21 = vld.sshfl [vmem:[#allocation1 + $0x30] sm:$0xff pattern:$0x73625140] }
 0x11a   :  { %1841 = vmatmul.f32.vlgmr.msrb.gmra.mxu1 %v3763_v56  ;;  %2091 = vmatpush.msra.mxu2 %v4389_v31  ;;  %v4391_v56 = vand.u32 4294901760, %v3919_v27  ;;  %v138_v10 = vsel %vm137_vm0, %v130_v21, 0 }
 0x11b   :  { %2042 = vmatpush.msra.mxu1 %v3824_v49  ;;  %2152 = vmatpush.msra.mxu3 %v3849_v44  ;;  %v4392_v49 = vand.u32 4294901760, %v3944_v60  ;;  %v2204_v27 = vand.u32 4294901760, %v138_v10 }
 0x11c   :  { %2004 = vmatpush.msra.mxu0 %v3944_v60  ;;  %2095 = vmatpush.msra.mxu2 %v4390_v29  ;;  %v4397_v60 = vand.u32 4294901760, %v4021_v30 }
 0x11d   :  { %2044 = vmatpush.msra.mxu1 %v3849_v44  ;;  %2154 = vmatpush.msra.mxu3 %v3869_v57  ;;  %v113_v44 = vld [vmem:[%s4245_s1 + $0x300] sm:$0xff] }
 0x11e   :  { %2007 = vmatpush.msra.mxu0 %v3961_v41  ;;  %2099 = vmatpush.msra.mxu2 %v4391_v56  ;;  %v2205_v41 = vsub.f32 %v138_v10, %v2204_v27 }
 0x11f   :  { %2046 = vmatpush.msra.mxu1 %v3869_v57  ;;  %2156 = vmatpush.msra.mxu3 %v3877_v46  ;;  %v4394_v57 = vand.u32 4294901760, %v3978_v45 }
 0x120   :  { %2010 = vmatpush.msra.mxu0 %v3978_v45  ;;  %2103 = vmatpush.msra.mxu2 %v4392_v49  ;;  %v2206_v45 = vand.u32 4294901760, %v2205_v41 }
 0x121   :  { %2048 = vmatpush.msra.mxu1 %v3877_v46  ;;  %2158 = vmatpush.msra.mxu3 %v3889_v50  ;;  %v2202_v46 = vand.u32 4294901760, %v113_v44 }
 0x122   :  { %2013 = vmatpush.msra.mxu0 %v3993_v51  ;;  %2107 = vmatpush.msra.mxu2 %v4393_v54 }
 0x123   :  { %2050 = vmatpush.msra.mxu1 %v3889_v50  ;;  %2160 = vmatpush.msra.mxu3 %v3912_v4  ;;  %v4395_v50 = vand.u32 4294901760, %v3993_v51 }
 0x124   :  { %2016 = vmatpush.msra.mxu0 %v4008_v32  ;;  %2111 = vmatpush.msra.mxu2 %v4394_v57 }
 0x125   :  { %2052 = vmatpush.msra.mxu1 %v3912_v4  ;;  %2162 = vmatpush.msra.mxu3 %v3930_v5  ;;  %v4396_v4 = vand.u32 4294901760, %v4008_v32 }
 0x126   :  { %2019 = vmatpush.msra.mxu0 %v4021_v30  ;;  %2115 = vmatpush.msra.mxu2 %v4395_v50  ;;  %v178_v30 = vpop.f32.mrf.mxu0 }
 0x127   :  { %2054 = vmatpush.msra.mxu1 %v3930_v5  ;;  %2164 = vmatpush.msra.mxu3 %v3946_v9  ;;  %v2228_v5 = vsub.f32 %v114_v0, %v2200_v14 }
 0x128   :  { %2022 = vmatpush.msra.mxu0 %v4037_v22  ;;  %2119 = vmatpush.msra.mxu2 %v4396_v4  ;;  %v279_v22 = vpop.f32.mrf.mxu1 }
 0x129   :  { %2056 = vmatpush.msra.mxu1 %v3946_v9  ;;  %2166 = vmatpush.msra.mxu3 %v3963_v53  ;;  %v2234_v9 = vsub.f32 %v113_v44, %v2202_v46 }
 0x12a   :  { %2025 = vmatpush.msra.mxu0 %v4053_v43  ;;  %2123 = vmatpush.msra.mxu2 %v4397_v60 }
 0x12b   :  { %2058 = vmatpush.msra.mxu1 %v3963_v53  ;;  %2168 = vmatpush.msra.mxu3 %v3980_v58  ;;  %v2229_v53 = vand.u32 4294901760, %v2228_v5 }
 0x12c   :  { %2028 = vmatpush.msra.mxu0 %v4074_v55  ;;  %2127 = vmatpush.msra.mxu2 %v1954_v18  ;;  %v2364_v18 = vld [vmem:[%s4246_s2] ss:$0 sm:$0xff]  ;;  %v372_v55 = vpop.f32.mrf.mxu3  ;;  %s2391_s2 = smov [#allocation2]  }
 0x12d   :  { %2060 = vmatpush.msra.mxu1 %v3980_v58  ;;  %2170 = vmatpush.msra.mxu3 %v3995_v2  ;;  %v2235_v58 = vand.u32 4294901760, %v2234_v9  ;;  %v2230_v51 = vsub.f32 %v2228_v5, %v2229_v53  ;;  %s2352_s21 = sshll.u32 %s2391_s2, 4  ;;  %s2353_s21 = int_to_ptr.vmem [resolvable:$true] %s2352_s21 }
 0x12e   :  { %2031 = vmatpush.msra.mxu0 %v4087_v63  ;;  %2131 = vmatpush.msra.mxu2 %v1960_v36  ;;  %v179_v36 = vadd.f32 %v2364_v18, %v178_v30  ;;  %v441_v63 = vpop.f32.mrf.mxu0 }
 0x12f   :  { %2062 = vmatpush.msra.mxu1 %v3995_v2  ;;  %2172 = vmatpush.msra.mxu3 %v4010_v8  ;;  %v2207_v2 = vsub.f32 %v2205_v41, %v2206_v45  ;;  %v2236_v43 = vsub.f32 %v2234_v9, %v2235_v58 }
 0x130   :  { %2034 = vmatpush.msra.mxu0 %v4101_v15  ;;  %2135 = vmatpush.msra.mxu2 %v1966_v47  ;;  %v478_v35 = vpop.f32.mrf.mxu1 }
 0x131   :  { %2064 = vmatpush.msra.mxu1 %v4010_v8  ;;  %2174 = vmatpush.msra.mxu3 %v4023_v23  ;;  %v2208_v32 = vand.u32 4294901760, %v2207_v2  ;;  %v2237_v8 = vand.u32 4294901760, %v2236_v43 }
 0x132   :  { %2037 = vmatmul.f32.vlgmr.msra.gmra.mxu0 %v4090_v1  ;;  %2139 = vmatpush.msra.mxu2 %v1972_v59 }
 0x133   :  { %2066 = vmatpush.msra.mxu1 %v4023_v23  ;;  %2176 = vmatpush.msra.mxu3 %v4045_v38  ;;  %v2231_v23 = vand.u32 4294901760, %v2230_v51 }
 0x134   :  { %2143 = vmatpush.msra.mxu2 %v1978_v16  ;;  %2201 = vmatpush.msrb.mxu0 %v2200_v14  ;;  %v620_v11 = vpop.f32.mrf.mxu3 }
 0x135   :  { %2068 = vmatpush.msra.mxu1 %v4045_v38  ;;  %2178 = vmatpush.msra.mxu3 %v4061_v17  ;;  %v280_v38 = vadd.f32 %v279_v22, %v179_v36 }
 0x136   :  { %2145 = vmatmul.f32.vlgmr.msra.gmra.mxu2 %v4063_v40  ;;  %2203 = vmatpush.msrb.mxu0 %v2202_v46  ;;  %v674_v52 = vpop.f32.mrf.mxu0 }
 0x137   :  { %2260 = vmatpush.msrb.mxu2 %v2228_v5  ;;  %2070 = vmatpush.msra.mxu1 %v4061_v17  ;;  %v333_v17 = vpop.f32.mrf.mxu2 }
 0x138   :  { %2180 = vmatpush.msra.mxu3 %v4076_v25  ;;  %2312 = vmatpush.msra.mxu0 %v2229_v53  ;;  %v713_v59 = vpop.f32.mrf.mxu1 }
 0x139   :  { %2182 = vmatmul.f32.vlgmr.msra.gmra.mxu3 %v4063_v40  ;;  %2072 = vmatpush.msra.mxu1 %v4076_v25  ;;  %v334_v40 = vadd.f32 %v333_v17, %v280_v38 }
 0x13a   :  { %2285 = vmatpush.msrb.mxu3 %v2200_v14  ;;  %2076 = vmatmul.f32.vlgmr.msra.gmra.mxu1 %v1879_v7 }
 0x13b   :  { %2232 = vmatpush.msrb.mxu1 %v2231_v23  ;;  %2263 = vmatpush.msrb.mxu2 %v2234_v9  ;;  %v373_v25 = vadd.f32 %v372_v55, %v334_v40 }
 0x13c   :  { %2287 = vmatpush.msrb.mxu3 %v2202_v46  ;;  %2209 = vmatmul.f32.vlgmr.msrb.gmra.mxu0 %v2208_v32  ;;  %v819_v16 = vpop.f32.mrf.mxu3 }
 0x13d   :  { %2238 = vmatpush.msrb.mxu1 %v2237_v8  ;;  %2316 = vmatpush.msra.mxu0 %v2235_v58  ;;  %v442_v1 = vadd.f32 %v441_v63, %v373_v25 }
 0x13e   :  { %2266 = vmatmul.f32.vlgmr.msrb.gmra.mxu2 %v2205_v41  ;;  %v860_v37 = vpop.f32.mrf.mxu0 }
 0x13f   :  { %2337 = vmatpush.msra.mxu1 %v2200_v14  ;;  %v479_v61 = vadd.f32 %v478_v35, %v442_v1  ;;  %v519_v47 = vpop.f32.mrf.mxu2 }
 0x140   :  { %v961_v33 = vpop.f32.mrf.mxu1 }
 0x141   :  { %2339 = vmatpush.msra.mxu1 %v2202_v46  ;;  %2291 = vmatmul.f32.vlgmr.msrb.gmra.mxu3 %v2206_v45  ;;  %v520_v15 = vadd.f32 %v519_v47, %v479_v61 }
 0x142   :  { %2240 = vmatmul.f32.vlgmr.msrb.gmra.mxu1 %v2204_v27 }
 0x143   :  { %v621_v24 = vadd.f32 %v620_v11, %v520_v15 }
 0x144   :  { %2318 = vmatmul.f32.vlgmr.msra.gmra.mxu0 %v2204_v27  ;;  %v1054_v26 = vpop.f32.mrf.mxu3 }
 0x145   :  { %v675_v7 = vadd.f32 %v674_v52, %v621_v24 }
 0x146   :  { %v1123_v19 = vpop.f32.mrf.mxu0 }
 0x147   :  { %v714_v3 = vadd.f32 %v713_v59, %v675_v7  ;;  %v782_v12 = vpop.f32.mrf.mxu2 }
 0x148   :  { %v1160_v42 = vpop.f32.mrf.mxu1 }
 0x149   :  { %v783_v6 = vadd.f32 %v782_v12, %v714_v3 }
 0x14a   :  { %2341 = vmatmul.f32.vlgmr.msra.gmra.mxu1 %v2204_v27 }
 0x14b   :  { %v820_v62 = vadd.f32 %v819_v16, %v783_v6 }
 0x14c   :  { %v1302_v49 = vpop.f32.mrf.mxu3 }
 0x14d   :  { %v861_v48 = vadd.f32 %v860_v37, %v820_v62 }
 0x14e   :  { %v1356_v54 = vpop.f32.mrf.mxu0 }
 0x14f   :  { %v962_v13 = vadd.f32 %v961_v33, %v861_v48  ;;  %v1015_v20 = vpop.f32.mrf.mxu2 }
 0x151   :  { %v1016_v39 = vadd.f32 %v1015_v20, %v962_v13 }
 0x153   :  { %v1055_v28 = vadd.f32 %v1054_v26, %v1016_v39  ;;  %v1395_v57 = vpop.f32.mrf.mxu1 }
 0x155   :  { %v1124_v34 = vadd.f32 %v1123_v19, %v1055_v28 }
 0x156   :  { %v1501_v14 = vpop.f32.mrf.mxu3 }
 0x157   :  { %v1161_v31 = vadd.f32 %v1160_v42, %v1124_v34  ;;  %v1201_v29 = vpop.f32.mrf.mxu2 }
 0x159   :  { %v1202_v56 = vadd.f32 %v1201_v29, %v1161_v31 }
 0x15b   :  { %v1303_v21 = vadd.f32 %v1302_v49, %v1202_v56 }
 0x15d   :  { %v1357_v0 = vadd.f32 %v1356_v54, %v1303_v21 }
 0x15f   :  { %v1396_v10 = vadd.f32 %v1395_v57, %v1357_v0  ;;  %v1464_v50 = vpop.f32.mrf.mxu2 }
 0x161   :  { %v1465_v44 = vadd.f32 %v1464_v50, %v1396_v10 }
 0x163   :  { %v1502_v27 = vadd.f32 %v1501_v14, %v1465_v44 }
 0x16b   :  { %v1542_v4 = vpop.f32.mrf.mxu0 }
 0x16c   :  { %v1543_v60 = vadd.f32 %v1542_v4, %v1502_v27 }
 0x175   :  { %v1643_v46 = vpop.f32.mrf.mxu1  ;;  %v1697_v41 = vpop.f32.mrf.mxu2 }
 0x176   :  { %v1644_v5 = vadd.f32 %v1643_v46, %v1543_v60 }
 0x178   :  { %v1698_v9 = vadd.f32 %v1697_v41, %v1644_v5  ;;  %v1736_v53 = vpop.f32.mrf.mxu3 }
 0x17a   :  { %v1737_v58 = vadd.f32 %v1736_v53, %v1698_v9 }
 0x18d   :  { %v1805_v45 = vpop.f32.mrf.mxu0 }
 0x18e   :  { %v1806_v2 = vadd.f32 %v1805_v45, %v1737_v58 }
 0x197   :  { %v1842_v51 = vpop.f32.mrf.mxu1  ;;  %v1883_v23 = vpop.f32.mrf.mxu2 }
 0x198   :  { %v1843_v43 = vadd.f32 %v1842_v51, %v1806_v2 }
 0x19a   :  { %v1884_v32 = vadd.f32 %v1883_v23, %v1843_v43  ;;  %v1984_v8 = vpop.f32.mrf.mxu3 }
 0x19c   :  { %v1985_v30 = vadd.f32 %v1984_v8, %v1884_v32 }
 0x1af   :  { %v2038_v18 = vpop.f32.mrf.mxu0 }
 0x1b0   :  { %v2039_v36 = vadd.f32 %v2038_v18, %v1985_v30 }
 0x1b7   :  { %v2077_v22 = vpop.f32.mrf.mxu1 }
 0x1b8   :  { %v2078_v38 = vadd.f32 %v2077_v22, %v2039_v36 }
 0x1b9   :  { %v2146_v17 = vpop.f32.mrf.mxu2  ;;  %v2210_v55 = vpop.f32.mrf.mxu0 }
 0x1ba   :  { %v2147_v40 = vadd.f32 %v2146_v17, %v2078_v38 }
 0x1bc   :  { %v2183_v25 = vpop.f32.mrf.mxu3 }
 0x1bd   :  { %v2184_v63 = vadd.f32 %v2183_v25, %v2147_v40 }
 0x1bf   :  { %v2211_v1 = vadd.f32 %v2210_v55, %v2184_v63  ;;  %v2241_v35 = vpop.f32.mrf.mxu1 }
 0x1c1   :  { %v2242_v61 = vadd.f32 %v2241_v35, %v2211_v1  ;;  %v2267_v47 = vpop.f32.mrf.mxu2  ;;  %v2319_v52 = vpop.f32.mrf.mxu0 }
 0x1c3   :  { %v2268_v15 = vadd.f32 %v2267_v47, %v2242_v61 }
 0x1c4   :  { %v2292_v11 = vpop.f32.mrf.mxu3 }
 0x1c5   :  { %v2293_v24 = vadd.f32 %v2292_v11, %v2268_v15 }
 0x1c7   :  { %v2320_v59 = vadd.f32 %v2319_v52, %v2293_v24  ;;  %v2342_v7 = vpop.f32.mrf.mxu1 }
 0x1c9   :  { %v2343_v3 = vadd.f32 %v2342_v7, %v2320_v59 }
 0x1cb   :  { %2346 = vst.msk [vmem:[#allocation2] sm:$0x3] %vm2345_vm1, %v2343_v3 }
 0x1cc   :  { %2357 = dma.vmem_to_hbm [thread:$0]  %s2353_s21, 32, %s2355_s24, [#allocation3]  }
 0x1cd   :  { %2389 = dma.done.wait [#allocation3], 32  }
 0x1ce   :  { %2390 = vsyncadd [#allocation3], 4294967264 }
 0x1cf   :  { %2362 = vsyncpa [#allocation3], 1 }

</bundles_post_ra>
